<compile_context>
chip_gen: v7x
topology: tpu7x:2x2x1
jax: 0.10.0
libtpu: 0.0.40
codegen_flags: <defaults>
</compile_context>

<pallas_src>
import jax
import jax.numpy as jnp
from jax.experimental import pallas as pl
from jax.experimental.pallas import tpu as pltpu

# ---- small hyper-parameters consistent with the module structure ----
NUM_LABELS = 10
VOCAB = 50
EMB = 32          # embedding_size
NUM_FEAT = 4      # num_features (AdaptiveMaxPool1d output length)
HIDDEN = 64       # hidden_size (fc1)
KERNELS = (3, 5, 9)
CHANNELS = 16     # conv channels
TITLE_HID = 16    # title_hidden_size
B = 2             # batch
L = 16            # document length
LT = 8            # title length

MAX_K = max(KERNELS)
L_EFF = L if L >= MAX_K else MAX_K + 1          # PyTorch get_features F.pad rule
L_PAD = ((L_EFF + 7) // 8) * 8                  # sublane-aligned per-doc length
OUT_PAD = 128                                   # lane-padded classifier width


def xmlcnn_titles_kernel(
    emb_x_ref,      # (B*L_PAD + MAX_K-1, EMB) flattened, zero-padded doc embeddings
    emb_t_ref,      # (B, LT, 2*EMB)   column t carries [x_t | x_{LT-1-t}]
    mask_ref,       # (B, LT, 2*TITLE_HID) per-step validity for [fwd | bwd] lanes
    w_tap_ref,      # (MAX_K, EMB, 3*CHANNELS) fused per-tap conv weights (zero taps)
    b_conv_ref,     # (1, 3*CHANNELS)
    wfc_cnn_ref,    # (3*NUM_FEAT*CHANNELS, HIDDEN)  reordered fc1 cnn block
    wih_ref,        # (2*EMB, 8*TITLE_HID)           block-diag, gate-permuted
    whh_ref,        # (2*TITLE_HID, 8*TITLE_HID)     block-diag, gate-permuted
    b_lstm_ref,     # (1, 8*TITLE_HID)
    wfc_t_ref,      # (2*TITLE_HID, HIDDEN)          fc1 title block ([h_f | h_b])
    bfc1_ref,       # (1, HIDDEN)
    wclf_ref,       # (HIDDEN, OUT_PAD)
    bclf_ref,       # (1, OUT_PAD)
    out_ref,        # (B, OUT_PAD)
):
    f32 = jnp.float32
    b_ = emb_t_ref.shape[0]
    n_rows = b_ * L_PAD

    # ---- CNN branch: 3 Conv1d's fused along channels, batched over B.
    # Each tap is one (B*L_PAD, EMB) @ (EMB, 3C) matmul; taps past a branch's kernel
    # width carry zero weights so batch-crossing rows contribute exactly 0.
    x_flat = emb_x_ref[...]
    acc = jnp.dot(x_flat[0:n_rows, :], w_tap_ref[0], preferred_element_type=f32)
    for dk in range(1, MAX_K):
        acc = acc + jnp.dot(x_flat[dk:dk + n_rows, :], w_tap_ref[dk],
                            preferred_element_type=f32)
    conv = jnp.maximum(acc + b_conv_ref[...], 0.0)          # ReLU, (B*L_PAD, 3C)
    conv = conv.reshape(b_, L_PAD, len(KERNELS) * CHANNELS)  # tile-aligned split

    # ---- AdaptiveMaxPool1d(NUM_FEAT) per branch, assembled into one (B, 192) slab,
    # ---- then a single (B,192)@(192,HIDDEN) matmul against the reordered fc1 block.
    pieces = []
    for j, k in enumerate(KERNELS):
        lout = L_EFF - k + 1
        cj = conv[:, :, j * CHANNELS:(j + 1) * CHANNELS]
        for f in range(NUM_FEAT):
            s = (f * lout) // NUM_FEAT
            e = ((f + 1) * lout + NUM_FEAT - 1) // NUM_FEAT
            pieces.append(jnp.max(cj[:, s:e, :], axis=1))    # (B, C)
    pooled = jnp.concatenate(pieces, axis=-1)                # (B, 3*F*C)
    cnn_hidden = jnp.dot(pooled, wfc_cnn_ref[...], preferred_element_type=f32)

    # ---- title bi-LSTM: hoisted input projection (one (B*LT,64)@(64,128) matmul),
    # ---- fwd/bwd interleaved in one loop on a combined [h_f|h_b] state, gates
    # ---- permuted to [i|f|o|g] -> one sigmoid over 3/4 of the lanes + one tanh.
    emb_t = emb_t_ref[...]                       # (B, LT, 2*EMB)
    lt = emb_t.shape[1]
    th2 = whh_ref.shape[0]                       # 2*TITLE_HID
    x_proj = (jnp.dot(emb_t.reshape(b_ * lt, emb_t.shape[2]), wih_ref[...],
                      preferred_element_type=f32)
              + b_lstm_ref[...]).reshape(b_, lt, 4 * th2)
    mask = mask_ref[...]
    whh = whh_ref[...]

    h = jnp.zeros((b_, th2), f32)                # [h_fwd | h_bwd]
    c = jnp.zeros((b_, th2), f32)
    for t in range(lt):  # packed_padded == length-masked recurrence (h/c zero-init)
        gates = x_proj[:, t, :] + jnp.dot(h, whh, preferred_element_type=f32)
        sig = jax.nn.sigmoid(gates[:, :3 * th2])             # [i | f | o]
        g = jnp.tanh(gates[:, 3 * th2:])
        c_new = sig[:, th2:2 * th2] * c + sig[:, :th2] * g
        h_new = sig[:, 2 * th2:3 * th2] * jnp.tanh(c_new)
        m = mask[:, t, :]
        h = m * h_new + (1.0 - m) * h
        c = m * c_new + (1.0 - m) * c

    # ---- fc1 (+ReLU; Dropout(0.5) = identity at inference) and padded classifier.
    pre = (cnn_hidden
           + jnp.dot(h, wfc_t_ref[...], preferred_element_type=f32)
           + bfc1_ref[...])
    hid_act = jnp.maximum(pre, 0.0)
    out_ref[...] = (jnp.dot(hid_act, wclf_ref[...], preferred_element_type=f32)
                    + bclf_ref[...])


def xmlcnn_titles_forward(x_tok, titles, title_len, params):
    """Glue: embedding gather + weight re-layout in JAX, then one pallas_call."""
    emb_table = params["emb"]
    emb_x = emb_table[x_tok]                 # (B, L, EMB)  (embedding_dropout = identity)
    emb_t = emb_table[titles]                # (B, LT, EMB)
    b, l = x_tok.shape

    # pad each doc to L_PAD (covers the PyTorch F.pad rule), flatten over batch and
    # append MAX_K-1 zero rows so every tap slice is in-bounds.
    emb_x = jnp.pad(emb_x, ((0, 0), (0, L_PAD - l), (0, 0)))
    emb_x_flat = jnp.pad(emb_x.reshape(b * L_PAD, EMB), ((0, MAX_K - 1), (0, 0)))

    # fused per-tap conv weights: (MAX_K, EMB, 3*C), zero taps beyond each kernel width
    w_tap = jnp.zeros((MAX_K, EMB, len(KERNELS) * CHANNELS), jnp.float32)
    for j, k in enumerate(KERNELS):
        wk = jnp.transpose(params[f"conv{k}_w"], (2, 1, 0))      # (k, EMB, C)
        w_tap = w_tap.at[:k, :, j * CHANNELS:(j + 1) * CHANNELS].set(wk)
    b_conv = jnp.concatenate([params[f"conv{k}_b"] for k in KERNELS])[None, :]

    # fc1 cnn columns reordered to the kernel's (branch, window, channel) slab order.
    # PyTorch flatten index is c*(3F) + j*F + f.
    d_cnn = CHANNELS * NUM_FEAT * len(KERNELS)
    wfc1 = params["fc1_w"]                                       # (HIDDEN, d_cnn + 2T)
    wfc_cnn = (wfc1[:, :d_cnn].reshape(HIDDEN, CHANNELS, len(KERNELS), NUM_FEAT)
               .transpose(2, 3, 1, 0).reshape(d_cnn, HIDDEN))    # (192, HIDDEN)
    wfc_title = wfc1[:, d_cnn:].T                                # (2T, HIDDEN) [h_f|h_b]

    # bi-LSTM weights: fwd/bwd fused block-diagonally, gate columns permuted from
    # PyTorch [i,f,g,o] to combined [i_f,i_b | f_f,f_b | o_f,o_b | g_f,g_b].
    def gate_cols(w_t, direction):
        i_, f_, g_, o_ = jnp.split(w_t, 4, axis=1)
        z = jnp.zeros_like(i_)
        blocks = ([i_, z, f_, z, o_, z, g_, z] if direction == 0
                  else [z, i_, z, f_, z, o_, z, g_])
        return jnp.concatenate(blocks, axis=1)

    wih_block = jnp.concatenate([gate_cols(params["lstm_wih_f"].T, 0),
                                 gate_cols(params["lstm_wih_b"].T, 1)], axis=0)
    whh_block = jnp.concatenate([gate_cols(params["lstm_whh_f"].T, 0),
                                 gate_cols(params["lstm_whh_b"].T, 1)], axis=0)
    b_lstm = (gate_cols((params["lstm_bih_f"] + params["lstm_bhh_f"])[None, :], 0)
              + gate_cols((params["lstm_bih_b"] + params["lstm_bhh_b"])[None, :], 1))

    # paired inputs/masks so both directions share one recurrence loop:
    # column t carries (x_t, x_{LT-1-t}) and (mask_t, mask_{LT-1-t}).
    emb_t_pair = jnp.concatenate([emb_t, emb_t[:, ::-1, :]], axis=-1)      # (B, LT, 2E)
    mask = (jnp.arange(titles.shape[1])[None, :] < title_len[:, None]).astype(jnp.float32)
    mask_pair = jnp.concatenate(
        [jnp.broadcast_to(mask[:, :, None], (b, titles.shape[1], TITLE_HID)),
         jnp.broadcast_to(mask[:, ::-1, None], (b, titles.shape[1], TITLE_HID))],
        axis=-1)                                                           # (B, LT, 2T)

    # classifier padded to 128 lanes so the final store is unmasked; sliced after.
    wclf = jnp.zeros((HIDDEN, OUT_PAD), jnp.float32).at[:, :NUM_LABELS].set(
        params["clf_w"].T)
    bclf = jnp.zeros((1, OUT_PAD), jnp.float32).at[:, :NUM_LABELS].set(params["clf_b"])

    args = [emb_x_flat, emb_t_pair, mask_pair,
            w_tap, b_conv, wfc_cnn,
            wih_block, whh_block, b_lstm,
            wfc_title, params["fc1_b"][None, :],
            wclf, bclf]

    out = pl.pallas_call(
        xmlcnn_titles_kernel,
        out_shape=jax.ShapeDtypeStruct((b, OUT_PAD), jnp.float32),
        in_specs=[pl.BlockSpec(memory_space=pltpu.MemorySpace.VMEM)] * len(args),
        out_specs=pl.BlockSpec(memory_space=pltpu.MemorySpace.VMEM),
    )(*args)
    return out[:, :NUM_LABELS]


def reference_forward(x_tok, titles, title_len, params):
    """Pure-JAX reference following the PyTorch code structure (NCW conv, flatten, concat)."""
    emb_table = params["emb"]
    emb = jnp.transpose(emb_table[x_tok], (0, 2, 1))        # (B, EMB, L) like PyTorch
    if emb.shape[-1] < max(KERNELS):
        emb = jnp.pad(emb, ((0, 0), (0, 0), (0, max(KERNELS) - emb.shape[-1] + 1)))
    feats = []
    for k in KERNELS:
        w = params[f"conv{k}_w"]
        bcv = params[f"conv{k}_b"]
        lout = emb.shape[-1] - k + 1
        out = jnp.stack([jnp.einsum("bel,cel->bc", emb[:, :, t:t + k], w)
                         for t in range(lout)], axis=2) + bcv[None, :, None]
        out = jnp.maximum(out, 0.0)                          # (B, C, lout)
        pooled = jnp.stack(
            [jnp.max(out[:, :, (f * lout) // NUM_FEAT:((f + 1) * lout + NUM_FEAT - 1) // NUM_FEAT],
                     axis=2) for f in range(NUM_FEAT)], axis=2)   # (B, C, F)
        feats.append(pooled)
    cnn_features = jnp.concatenate(feats, axis=2).reshape(x_tok.shape[0], -1)

    emb_t = emb_table[titles]
    mask = (jnp.arange(titles.shape[1])[None, :] < title_len[:, None]).astype(jnp.float32)

    def lstm_dir(wih, whh, bih, bhh, reverse):
        hh = jnp.zeros((x_tok.shape[0], TITLE_HID), jnp.float32)
        cc = jnp.zeros((x_tok.shape[0], TITLE_HID), jnp.float32)
        steps = range(titles.shape[1] - 1, -1, -1) if reverse else range(titles.shape[1])
        for t in steps:
            g = emb_t[:, t, :] @ wih.T + hh @ whh.T + bih + bhh
            i_g = jax.nn.sigmoid(g[:, 0:TITLE_HID])
            f_g = jax.nn.sigmoid(g[:, TITLE_HID:2 * TITLE_HID])
            g_g = jnp.tanh(g[:, 2 * TITLE_HID:3 * TITLE_HID])
            o_g = jax.nn.sigmoid(g[:, 3 * TITLE_HID:4 * TITLE_HID])
            c_new = f_g * cc + i_g * g_g
            h_new = o_g * jnp.tanh(c_new)
            m = mask[:, t:t + 1]
            hh = m * h_new + (1.0 - m) * hh
            cc = m * c_new + (1.0 - m) * cc
        return hh

    h_f = lstm_dir(params["lstm_wih_f"], params["lstm_whh_f"],
                   params["lstm_bih_f"], params["lstm_bhh_f"], False)
    h_b = lstm_dir(params["lstm_wih_b"], params["lstm_whh_b"],
                   params["lstm_bih_b"], params["lstm_bhh_b"], True)

    features = jnp.concatenate([cnn_features, h_f, h_b], axis=1)
    hid = jnp.maximum(features @ params["fc1_w"].T + params["fc1_b"], 0.0)
    return hid @ params["clf_w"].T + params["clf_b"]


if __name__ == "__main__":
    key = jax.random.PRNGKey(0)
    ks = jax.random.split(key, 20)
    params = {}
    emb = jax.random.normal(ks[0], (VOCAB, EMB), jnp.float32) * 0.5
    params["emb"] = emb.at[1].set(0.0)                  # padding_idx=1
    i = 1
    for k in KERNELS:
        params[f"conv{k}_w"] = jax.random.normal(ks[i], (CHANNELS, EMB, k), jnp.float32) * 0.1; i += 1
        params[f"conv{k}_b"] = jax.random.normal(ks[i], (CHANNELS,), jnp.float32) * 0.1; i += 1
    d_in = CHANNELS * NUM_FEAT * len(KERNELS) + 2 * TITLE_HID
    params["fc1_w"] = jax.random.normal(ks[i], (HIDDEN, d_in), jnp.float32) * 0.05; i += 1
    params["fc1_b"] = jax.random.normal(ks[i], (HIDDEN,), jnp.float32) * 0.05; i += 1
    params["clf_w"] = jax.random.normal(ks[i], (NUM_LABELS, HIDDEN), jnp.float32) * 0.05; i += 1
    params["clf_b"] = jax.random.normal(ks[i], (NUM_LABELS,), jnp.float32) * 0.05; i += 1
    for d in ("f", "b"):
        params[f"lstm_wih_{d}"] = jax.random.normal(ks[i], (4 * TITLE_HID, EMB), jnp.float32) * 0.1; i += 1
        params[f"lstm_whh_{d}"] = jax.random.normal(ks[i], (4 * TITLE_HID, TITLE_HID), jnp.float32) * 0.1; i += 1
        params[f"lstm_bih_{d}"] = jax.random.normal(ks[i], (4 * TITLE_HID,), jnp.float32) * 0.1; i += 1
        params[f"lstm_bhh_{d}"] = jax.random.normal(ks[i], (4 * TITLE_HID,), jnp.float32) * 0.1; i += 1

    kx, kt = jax.random.split(jax.random.PRNGKey(42), 2)
    x_tok = jax.random.randint(kx, (B, L), 0, VOCAB, dtype=jnp.int32)
    titles = jax.random.randint(kt, (B, LT), 0, VOCAB, dtype=jnp.int32)
    title_len = jnp.array([LT, LT - 2], dtype=jnp.int32)   # descending, as pack_padded requires

    out = jax.block_until_ready(xmlcnn_titles_forward(x_tok, titles, title_len, params))
    ref = jax.block_until_ready(reference_forward(x_tok, titles, title_len, params))

    if out.shape != (B, NUM_LABELS) or not jnp.allclose(out, ref, atol=1e-2, rtol=1e-2):
        raise SystemExit(f"mismatch: max abs err = {float(jnp.max(jnp.abs(out - ref)))}")
    print("KERNEL_OK")
</pallas_src>

<mosaic_0001>
module attributes {stable_mosaic.version = 11 : i64} {
  func.func @xmlcnn_titles_kernel(%arg0: memref<40x32xf32, #tpu.memory_space<vmem>>, %arg1: memref<2x8x64xf32, #tpu.memory_space<vmem>>, %arg2: memref<2x8x32xf32, #tpu.memory_space<vmem>>, %arg3: memref<9x32x48xf32, #tpu.memory_space<vmem>>, %arg4: memref<1x48xf32, #tpu.memory_space<vmem>>, %arg5: memref<192x64xf32, #tpu.memory_space<vmem>>, %arg6: memref<64x128xf32, #tpu.memory_space<vmem>>, %arg7: memref<32x128xf32, #tpu.memory_space<vmem>>, %arg8: memref<1x128xf32, #tpu.memory_space<vmem>>, %arg9: memref<32x64xf32, #tpu.memory_space<vmem>>, %arg10: memref<1x64xf32, #tpu.memory_space<vmem>>, %arg11: memref<64x128xf32, #tpu.memory_space<vmem>>, %arg12: memref<1x128xf32, #tpu.memory_space<vmem>>, %arg13: memref<2x128xf32, #tpu.memory_space<vmem>>) attributes {dimension_semantics = [], scalar_prefetch = 0 : i64, scratch_operands = 0 : i64, tpu.core_type = #tpu.core_type<tc>} {
    %c0 = arith.constant 0 : index
    %c0_0 = arith.constant 0 : index
    %0 = vector.load %arg0[%c0, %c0_0] : memref<40x32xf32, #tpu.memory_space<vmem>>, vector<40x32xf32>
    %1 = vector.extract_strided_slice %0 {offsets = [0, 0], sizes = [32, 32], strides = [1, 1]} : vector<40x32xf32> to vector<32x32xf32>
    %c0_1 = arith.constant 0 : index
    %c0_2 = arith.constant 0 : index
    %c0_3 = arith.constant 0 : index
    %2 = vector.load %arg3[%c0_1, %c0_2, %c0_3] : memref<9x32x48xf32, #tpu.memory_space<vmem>>, vector<1x32x48xf32>
    %3 = vector.shape_cast %2 : vector<1x32x48xf32> to vector<32x48xf32>
    %cst = arith.constant dense<0.000000e+00> : vector<32x48xf32>
    %4 = tpu.matmul %1, %3, %cst {dimension_numbers = #tpu.dot_dimension_numbers<[1], [0], [0], [1], [0, 0, 1, 1], [], []>} : vector<32x32xf32>, vector<32x48xf32>, vector<32x48xf32> -> vector<32x48xf32>
    %5 = vector.extract_strided_slice %0 {offsets = [1, 0], sizes = [32, 32], strides = [1, 1]} : vector<40x32xf32> to vector<32x32xf32>
    %c1 = arith.constant 1 : index
    %c0_4 = arith.constant 0 : index
    %c0_5 = arith.constant 0 : index
    %6 = vector.load %arg3[%c1, %c0_4, %c0_5] : memref<9x32x48xf32, #tpu.memory_space<vmem>>, vector<1x32x48xf32>
    %7 = vector.shape_cast %6 : vector<1x32x48xf32> to vector<32x48xf32>
    %cst_6 = arith.constant dense<0.000000e+00> : vector<32x48xf32>
    %8 = tpu.matmul %5, %7, %cst_6 {dimension_numbers = #tpu.dot_dimension_numbers<[1], [0], [0], [1], [0, 0, 1, 1], [], []>} : vector<32x32xf32>, vector<32x48xf32>, vector<32x48xf32> -> vector<32x48xf32>
    %9 = arith.addf %4, %8 : vector<32x48xf32>
    %10 = vector.extract_strided_slice %0 {offsets = [2, 0], sizes = [32, 32], strides = [1, 1]} : vector<40x32xf32> to vector<32x32xf32>
    %c2 = arith.constant 2 : index
    %c0_7 = arith.constant 0 : index
    %c0_8 = arith.constant 0 : index
    %11 = vector.load %arg3[%c2, %c0_7, %c0_8] : memref<9x32x48xf32, #tpu.memory_space<vmem>>, vector<1x32x48xf32>
    %12 = vector.shape_cast %11 : vector<1x32x48xf32> to vector<32x48xf32>
    %cst_9 = arith.constant dense<0.000000e+00> : vector<32x48xf32>
    %13 = tpu.matmul %10, %12, %cst_9 {dimension_numbers = #tpu.dot_dimension_numbers<[1], [0], [0], [1], [0, 0, 1, 1], [], []>} : vector<32x32xf32>, vector<32x48xf32>, vector<32x48xf32> -> vector<32x48xf32>
    %14 = arith.addf %9, %13 : vector<32x48xf32>
    %15 = vector.extract_strided_slice %0 {offsets = [3, 0], sizes = [32, 32], strides = [1, 1]} : vector<40x32xf32> to vector<32x32xf32>
    %c3 = arith.constant 3 : index
    %c0_10 = arith.constant 0 : index
    %c0_11 = arith.constant 0 : index
    %16 = vector.load %arg3[%c3, %c0_10, %c0_11] : memref<9x32x48xf32, #tpu.memory_space<vmem>>, vector<1x32x48xf32>
    %17 = vector.shape_cast %16 : vector<1x32x48xf32> to vector<32x48xf32>
    %cst_12 = arith.constant dense<0.000000e+00> : vector<32x48xf32>
    %18 = tpu.matmul %15, %17, %cst_12 {dimension_numbers = #tpu.dot_dimension_numbers<[1], [0], [0], [1], [0, 0, 1, 1], [], []>} : vector<32x32xf32>, vector<32x48xf32>, vector<32x48xf32> -> vector<32x48xf32>
    %19 = arith.addf %14, %18 : vector<32x48xf32>
    %20 = vector.extract_strided_slice %0 {offsets = [4, 0], sizes = [32, 32], strides = [1, 1]} : vector<40x32xf32> to vector<32x32xf32>
    %c4 = arith.constant 4 : index
    %c0_13 = arith.constant 0 : index
    %c0_14 = arith.constant 0 : index
    %21 = vector.load %arg3[%c4, %c0_13, %c0_14] : memref<9x32x48xf32, #tpu.memory_space<vmem>>, vector<1x32x48xf32>
    %22 = vector.shape_cast %21 : vector<1x32x48xf32> to vector<32x48xf32>
    %cst_15 = arith.constant dense<0.000000e+00> : vector<32x48xf32>
    %23 = tpu.matmul %20, %22, %cst_15 {dimension_numbers = #tpu.dot_dimension_numbers<[1], [0], [0], [1], [0, 0, 1, 1], [], []>} : vector<32x32xf32>, vector<32x48xf32>, vector<32x48xf32> -> vector<32x48xf32>
    %24 = arith.addf %19, %23 : vector<32x48xf32>
    %25 = vector.extract_strided_slice %0 {offsets = [5, 0], sizes = [32, 32], strides = [1, 1]} : vector<40x32xf32> to vector<32x32xf32>
    %c5 = arith.constant 5 : index
    %c0_16 = arith.constant 0 : index
    %c0_17 = arith.constant 0 : index
    %26 = vector.load %arg3[%c5, %c0_16, %c0_17] : memref<9x32x48xf32, #tpu.memory_space<vmem>>, vector<1x32x48xf32>
    %27 = vector.shape_cast %26 : vector<1x32x48xf32> to vector<32x48xf32>
    %cst_18 = arith.constant dense<0.000000e+00> : vector<32x48xf32>
    %28 = tpu.matmul %25, %27, %cst_18 {dimension_numbers = #tpu.dot_dimension_numbers<[1], [0], [0], [1], [0, 0, 1, 1], [], []>} : vector<32x32xf32>, vector<32x48xf32>, vector<32x48xf32> -> vector<32x48xf32>
    %29 = arith.addf %24, %28 : vector<32x48xf32>
    %30 = vector.extract_strided_slice %0 {offsets = [6, 0], sizes = [32, 32], strides = [1, 1]} : vector<40x32xf32> to vector<32x32xf32>
    %c6 = arith.constant 6 : index
    %c0_19 = arith.constant 0 : index
    %c0_20 = arith.constant 0 : index
    %31 = vector.load %arg3[%c6, %c0_19, %c0_20] : memref<9x32x48xf32, #tpu.memory_space<vmem>>, vector<1x32x48xf32>
    %32 = vector.shape_cast %31 : vector<1x32x48xf32> to vector<32x48xf32>
    %cst_21 = arith.constant dense<0.000000e+00> : vector<32x48xf32>
    %33 = tpu.matmul %30, %32, %cst_21 {dimension_numbers = #tpu.dot_dimension_numbers<[1], [0], [0], [1], [0, 0, 1, 1], [], []>} : vector<32x32xf32>, vector<32x48xf32>, vector<32x48xf32> -> vector<32x48xf32>
    %34 = arith.addf %29, %33 : vector<32x48xf32>
    %35 = vector.extract_strided_slice %0 {offsets = [7, 0], sizes = [32, 32], strides = [1, 1]} : vector<40x32xf32> to vector<32x32xf32>
    %c7 = arith.constant 7 : index
    %c0_22 = arith.constant 0 : index
    %c0_23 = arith.constant 0 : index
    %36 = vector.load %arg3[%c7, %c0_22, %c0_23] : memref<9x32x48xf32, #tpu.memory_space<vmem>>, vector<1x32x48xf32>
    %37 = vector.shape_cast %36 : vector<1x32x48xf32> to vector<32x48xf32>
    %cst_24 = arith.constant dense<0.000000e+00> : vector<32x48xf32>
    %38 = tpu.matmul %35, %37, %cst_24 {dimension_numbers = #tpu.dot_dimension_numbers<[1], [0], [0], [1], [0, 0, 1, 1], [], []>} : vector<32x32xf32>, vector<32x48xf32>, vector<32x48xf32> -> vector<32x48xf32>
    %39 = arith.addf %34, %38 : vector<32x48xf32>
    %40 = vector.extract_strided_slice %0 {offsets = [8, 0], sizes = [32, 32], strides = [1, 1]} : vector<40x32xf32> to vector<32x32xf32>
    %c8 = arith.constant 8 : index
    %c0_25 = arith.constant 0 : index
    %c0_26 = arith.constant 0 : index
    %41 = vector.load %arg3[%c8, %c0_25, %c0_26] : memref<9x32x48xf32, #tpu.memory_space<vmem>>, vector<1x32x48xf32>
    %42 = vector.shape_cast %41 : vector<1x32x48xf32> to vector<32x48xf32>
    %cst_27 = arith.constant dense<0.000000e+00> : vector<32x48xf32>
    %43 = tpu.matmul %40, %42, %cst_27 {dimension_numbers = #tpu.dot_dimension_numbers<[1], [0], [0], [1], [0, 0, 1, 1], [], []>} : vector<32x32xf32>, vector<32x48xf32>, vector<32x48xf32> -> vector<32x48xf32>
    %44 = arith.addf %39, %43 : vector<32x48xf32>
    %c0_28 = arith.constant 0 : index
    %c0_29 = arith.constant 0 : index
    %45 = vector.load %arg4[%c0_28, %c0_29] : memref<1x48xf32, #tpu.memory_space<vmem>>, vector<1x48xf32>
    %46 = vector.broadcast %45 : vector<1x48xf32> to vector<32x48xf32>
    %47 = arith.addf %44, %46 : vector<32x48xf32>
    %cst_30 = arith.constant 0.000000e+00 : f32
    %48 = vector.broadcast %cst_30 : f32 to vector<32x48xf32>
    %49 = arith.maximumf %47, %48 : vector<32x48xf32>
    %50 = vector.shape_cast %49 : vector<32x48xf32> to vector<2x16x48xf32>
    %51 = vector.extract_strided_slice %50 {offsets = [0, 0, 0], sizes = [2, 16, 16], strides = [1, 1, 1]} : vector<2x16x48xf32> to vector<2x16x16xf32>
    %52 = vector.extract_strided_slice %51 {offsets = [0, 0, 0], sizes = [2, 4, 16], strides = [1, 1, 1]} : vector<2x16x16xf32> to vector<2x4x16xf32>
    %cst_31 = arith.constant dense<0xFF800000> : vector<2x16xf32>
    %53 = vector.multi_reduction <maximumf>, %52, %cst_31 [1] : vector<2x4x16xf32> to vector<2x16xf32>
    %54 = vector.extract_strided_slice %51 {offsets = [0, 3, 0], sizes = [2, 4, 16], strides = [1, 1, 1]} : vector<2x16x16xf32> to vector<2x4x16xf32>
    %cst_32 = arith.constant dense<0xFF800000> : vector<2x16xf32>
    %55 = vector.multi_reduction <maximumf>, %54, %cst_32 [1] : vector<2x4x16xf32> to vector<2x16xf32>
    %56 = vector.extract_strided_slice %51 {offsets = [0, 7, 0], sizes = [2, 4, 16], strides = [1, 1, 1]} : vector<2x16x16xf32> to vector<2x4x16xf32>
    %cst_33 = arith.constant dense<0xFF800000> : vector<2x16xf32>
    %57 = vector.multi_reduction <maximumf>, %56, %cst_33 [1] : vector<2x4x16xf32> to vector<2x16xf32>
    %58 = vector.extract_strided_slice %51 {offsets = [0, 10, 0], sizes = [2, 4, 16], strides = [1, 1, 1]} : vector<2x16x16xf32> to vector<2x4x16xf32>
    %cst_34 = arith.constant dense<0xFF800000> : vector<2x16xf32>
    %59 = vector.multi_reduction <maximumf>, %58, %cst_34 [1] : vector<2x4x16xf32> to vector<2x16xf32>
    %60 = vector.extract_strided_slice %50 {offsets = [0, 0, 16], sizes = [2, 16, 16], strides = [1, 1, 1]} : vector<2x16x48xf32> to vector<2x16x16xf32>
    %61 = vector.extract_strided_slice %60 {offsets = [0, 0, 0], sizes = [2, 3, 16], strides = [1, 1, 1]} : vector<2x16x16xf32> to vector<2x3x16xf32>
    %cst_35 = arith.constant dense<0xFF800000> : vector<2x16xf32>
    %62 = vector.multi_reduction <maximumf>, %61, %cst_35 [1] : vector<2x3x16xf32> to vector<2x16xf32>
    %63 = vector.extract_strided_slice %60 {offsets = [0, 3, 0], sizes = [2, 3, 16], strides = [1, 1, 1]} : vector<2x16x16xf32> to vector<2x3x16xf32>
    %cst_36 = arith.constant dense<0xFF800000> : vector<2x16xf32>
    %64 = vector.multi_reduction <maximumf>, %63, %cst_36 [1] : vector<2x3x16xf32> to vector<2x16xf32>
    %65 = vector.extract_strided_slice %60 {offsets = [0, 6, 0], sizes = [2, 3, 16], strides = [1, 1, 1]} : vector<2x16x16xf32> to vector<2x3x16xf32>
    %cst_37 = arith.constant dense<0xFF800000> : vector<2x16xf32>
    %66 = vector.multi_reduction <maximumf>, %65, %cst_37 [1] : vector<2x3x16xf32> to vector<2x16xf32>
    %67 = vector.extract_strided_slice %60 {offsets = [0, 9, 0], sizes = [2, 3, 16], strides = [1, 1, 1]} : vector<2x16x16xf32> to vector<2x3x16xf32>
    %cst_38 = arith.constant dense<0xFF800000> : vector<2x16xf32>
    %68 = vector.multi_reduction <maximumf>, %67, %cst_38 [1] : vector<2x3x16xf32> to vector<2x16xf32>
    %69 = vector.extract_strided_slice %50 {offsets = [0, 0, 32], sizes = [2, 16, 16], strides = [1, 1, 1]} : vector<2x16x48xf32> to vector<2x16x16xf32>
    %70 = vector.extract_strided_slice %69 {offsets = [0, 0, 0], sizes = [2, 2, 16], strides = [1, 1, 1]} : vector<2x16x16xf32> to vector<2x2x16xf32>
    %cst_39 = arith.constant dense<0xFF800000> : vector<2x16xf32>
    %71 = vector.multi_reduction <maximumf>, %70, %cst_39 [1] : vector<2x2x16xf32> to vector<2x16xf32>
    %72 = vector.extract_strided_slice %69 {offsets = [0, 2, 0], sizes = [2, 2, 16], strides = [1, 1, 1]} : vector<2x16x16xf32> to vector<2x2x16xf32>
    %cst_40 = arith.constant dense<0xFF800000> : vector<2x16xf32>
    %73 = vector.multi_reduction <maximumf>, %72, %cst_40 [1] : vector<2x2x16xf32> to vector<2x16xf32>
    %74 = vector.extract_strided_slice %69 {offsets = [0, 4, 0], sizes = [2, 2, 16], strides = [1, 1, 1]} : vector<2x16x16xf32> to vector<2x2x16xf32>
    %cst_41 = arith.constant dense<0xFF800000> : vector<2x16xf32>
    %75 = vector.multi_reduction <maximumf>, %74, %cst_41 [1] : vector<2x2x16xf32> to vector<2x16xf32>
    %76 = vector.extract_strided_slice %69 {offsets = [0, 6, 0], sizes = [2, 2, 16], strides = [1, 1, 1]} : vector<2x16x16xf32> to vector<2x2x16xf32>
    %cst_42 = arith.constant dense<0xFF800000> : vector<2x16xf32>
    %77 = vector.multi_reduction <maximumf>, %76, %cst_42 [1] : vector<2x2x16xf32> to vector<2x16xf32>
    %78 = tpu.concatenate %53, %55, %57, %59, %62, %64, %66, %68, %71, %73, %75, %77 in 1 : vector<2x16xf32>, vector<2x16xf32>, vector<2x16xf32>, vector<2x16xf32>, vector<2x16xf32>, vector<2x16xf32>, vector<2x16xf32>, vector<2x16xf32>, vector<2x16xf32>, vector<2x16xf32>, vector<2x16xf32>, vector<2x16xf32> -> vector<2x192xf32>
    %c0_43 = arith.constant 0 : index
    %c0_44 = arith.constant 0 : index
    %79 = vector.load %arg5[%c0_43, %c0_44] : memref<192x64xf32, #tpu.memory_space<vmem>>, vector<192x64xf32>
    %cst_45 = arith.constant dense<0.000000e+00> : vector<2x64xf32>
    %80 = tpu.matmul %78, %79, %cst_45 {dimension_numbers = #tpu.dot_dimension_numbers<[1], [0], [0], [1], [0, 0, 1, 1], [], []>} : vector<2x192xf32>, vector<192x64xf32>, vector<2x64xf32> -> vector<2x64xf32>
    %c0_46 = arith.constant 0 : index
    %c0_47 = arith.constant 0 : index
    %c0_48 = arith.constant 0 : index
    %81 = vector.load %arg1[%c0_46, %c0_47, %c0_48] : memref<2x8x64xf32, #tpu.memory_space<vmem>>, vector<2x8x64xf32>
    %82 = vector.shape_cast %81 : vector<2x8x64xf32> to vector<16x64xf32>
    %c0_49 = arith.constant 0 : index
    %c0_50 = arith.constant 0 : index
    %83 = vector.load %arg6[%c0_49, %c0_50] : memref<64x128xf32, #tpu.memory_space<vmem>>, vector<64x128xf32>
    %cst_51 = arith.constant dense<0.000000e+00> : vector<16x128xf32>
    %84 = tpu.matmul %82, %83, %cst_51 {dimension_numbers = #tpu.dot_dimension_numbers<[1], [0], [0], [1], [0, 0, 1, 1], [], []>} : vector<16x64xf32>, vector<64x128xf32>, vector<16x128xf32> -> vector<16x128xf32>
    %c0_52 = arith.constant 0 : index
    %c0_53 = arith.constant 0 : index
    %85 = vector.load %arg8[%c0_52, %c0_53] : memref<1x128xf32, #tpu.memory_space<vmem>>, vector<1x128xf32>
    %86 = vector.broadcast %85 : vector<1x128xf32> to vector<16x128xf32>
    %87 = arith.addf %84, %86 : vector<16x128xf32>
    %88 = vector.shape_cast %87 : vector<16x128xf32> to vector<2x8x128xf32>
    %c0_54 = arith.constant 0 : index
    %c0_55 = arith.constant 0 : index
    %c0_56 = arith.constant 0 : index
    %89 = vector.load %arg2[%c0_54, %c0_55, %c0_56] : memref<2x8x32xf32, #tpu.memory_space<vmem>>, vector<2x8x32xf32>
    %c0_57 = arith.constant 0 : index
    %c0_58 = arith.constant 0 : index
    %90 = vector.load %arg7[%c0_57, %c0_58] : memref<32x128xf32, #tpu.memory_space<vmem>>, vector<32x128xf32>
    %cst_59 = arith.constant 0.000000e+00 : f32
    %91 = vector.broadcast %cst_59 : f32 to vector<2x32xf32>
    %cst_60 = arith.constant 0.000000e+00 : f32
    %92 = vector.broadcast %cst_60 : f32 to vector<2x32xf32>
    %93 = vector.extract_strided_slice %88 {offsets = [0, 0, 0], sizes = [2, 1, 128], strides = [1, 1, 1]} : vector<2x8x128xf32> to vector<2x1x128xf32>
    %94 = vector.shape_cast %93 : vector<2x1x128xf32> to vector<2x128xf32>
    %cst_61 = arith.constant dense<0.000000e+00> : vector<2x128xf32>
    %95 = tpu.matmul %91, %90, %cst_61 {dimension_numbers = #tpu.dot_dimension_numbers<[1], [0], [0], [1], [0, 0, 1, 1], [], []>} : vector<2x32xf32>, vector<32x128xf32>, vector<2x128xf32> -> vector<2x128xf32>
    %96 = arith.addf %94, %95 : vector<2x128xf32>
    %97 = vector.extract_strided_slice %96 {offsets = [0, 0], sizes = [2, 96], strides = [1, 1]} : vector<2x128xf32> to vector<2x96xf32>
    %98 = arith.negf %97 : vector<2x96xf32>
    %99 = math.exp %98 : vector<2x96xf32>
    %cst_62 = arith.constant 1.000000e+00 : f32
    %100 = vector.broadcast %cst_62 : f32 to vector<2x96xf32>
    %101 = arith.addf %100, %99 : vector<2x96xf32>
    %102 = arith.divf %100, %101 : vector<2x96xf32>
    %103 = vector.extract_strided_slice %96 {offsets = [0, 96], sizes = [2, 32], strides = [1, 1]} : vector<2x128xf32> to vector<2x32xf32>
    %104 = math.tanh %103 : vector<2x32xf32>
    %105 = vector.extract_strided_slice %102 {offsets = [0, 32], sizes = [2, 32], strides = [1, 1]} : vector<2x96xf32> to vector<2x32xf32>
    %106 = arith.mulf %105, %92 : vector<2x32xf32>
    %107 = vector.extract_strided_slice %102 {offsets = [0, 0], sizes = [2, 32], strides = [1, 1]} : vector<2x96xf32> to vector<2x32xf32>
    %108 = arith.mulf %107, %104 : vector<2x32xf32>
    %109 = arith.addf %106, %108 : vector<2x32xf32>
    %110 = vector.extract_strided_slice %102 {offsets = [0, 64], sizes = [2, 32], strides = [1, 1]} : vector<2x96xf32> to vector<2x32xf32>
    %111 = math.tanh %109 : vector<2x32xf32>
    %112 = arith.mulf %110, %111 : vector<2x32xf32>
    %113 = vector.extract_strided_slice %89 {offsets = [0, 0, 0], sizes = [2, 1, 32], strides = [1, 1, 1]} : vector<2x8x32xf32> to vector<2x1x32xf32>
    %114 = vector.shape_cast %113 : vector<2x1x32xf32> to vector<2x32xf32>
    %115 = arith.mulf %114, %112 : vector<2x32xf32>
    %cst_63 = arith.constant 1.000000e+00 : f32
    %116 = vector.broadcast %cst_63 : f32 to vector<2x32xf32>
    %117 = arith.subf %116, %114 : vector<2x32xf32>
    %118 = arith.mulf %117, %91 : vector<2x32xf32>
    %119 = arith.addf %115, %118 : vector<2x32xf32>
    %120 = arith.mulf %114, %109 : vector<2x32xf32>
    %cst_64 = arith.constant 1.000000e+00 : f32
    %121 = vector.broadcast %cst_64 : f32 to vector<2x32xf32>
    %122 = arith.subf %121, %114 : vector<2x32xf32>
    %123 = arith.mulf %122, %92 : vector<2x32xf32>
    %124 = arith.addf %120, %123 : vector<2x32xf32>
    %125 = vector.extract_strided_slice %88 {offsets = [0, 1, 0], sizes = [2, 1, 128], strides = [1, 1, 1]} : vector<2x8x128xf32> to vector<2x1x128xf32>
    %126 = vector.shape_cast %125 : vector<2x1x128xf32> to vector<2x128xf32>
    %cst_65 = arith.constant dense<0.000000e+00> : vector<2x128xf32>
    %127 = tpu.matmul %119, %90, %cst_65 {dimension_numbers = #tpu.dot_dimension_numbers<[1], [0], [0], [1], [0, 0, 1, 1], [], []>} : vector<2x32xf32>, vector<32x128xf32>, vector<2x128xf32> -> vector<2x128xf32>
    %128 = arith.addf %126, %127 : vector<2x128xf32>
    %129 = vector.extract_strided_slice %128 {offsets = [0, 0], sizes = [2, 96], strides = [1, 1]} : vector<2x128xf32> to vector<2x96xf32>
    %130 = arith.negf %129 : vector<2x96xf32>
    %131 = math.exp %130 : vector<2x96xf32>
    %cst_66 = arith.constant 1.000000e+00 : f32
    %132 = vector.broadcast %cst_66 : f32 to vector<2x96xf32>
    %133 = arith.addf %132, %131 : vector<2x96xf32>
    %134 = arith.divf %132, %133 : vector<2x96xf32>
    %135 = vector.extract_strided_slice %128 {offsets = [0, 96], sizes = [2, 32], strides = [1, 1]} : vector<2x128xf32> to vector<2x32xf32>
    %136 = math.tanh %135 : vector<2x32xf32>
    %137 = vector.extract_strided_slice %134 {offsets = [0, 32], sizes = [2, 32], strides = [1, 1]} : vector<2x96xf32> to vector<2x32xf32>
    %138 = arith.mulf %137, %124 : vector<2x32xf32>
    %139 = vector.extract_strided_slice %134 {offsets = [0, 0], sizes = [2, 32], strides = [1, 1]} : vector<2x96xf32> to vector<2x32xf32>
    %140 = arith.mulf %139, %136 : vector<2x32xf32>
    %141 = arith.addf %138, %140 : vector<2x32xf32>
    %142 = vector.extract_strided_slice %134 {offsets = [0, 64], sizes = [2, 32], strides = [1, 1]} : vector<2x96xf32> to vector<2x32xf32>
    %143 = math.tanh %141 : vector<2x32xf32>
    %144 = arith.mulf %142, %143 : vector<2x32xf32>
    %145 = vector.extract_strided_slice %89 {offsets = [0, 1, 0], sizes = [2, 1, 32], strides = [1, 1, 1]} : vector<2x8x32xf32> to vector<2x1x32xf32>
    %146 = vector.shape_cast %145 : vector<2x1x32xf32> to vector<2x32xf32>
    %147 = arith.mulf %146, %144 : vector<2x32xf32>
    %cst_67 = arith.constant 1.000000e+00 : f32
    %148 = vector.broadcast %cst_67 : f32 to vector<2x32xf32>
    %149 = arith.subf %148, %146 : vector<2x32xf32>
    %150 = arith.mulf %149, %119 : vector<2x32xf32>
    %151 = arith.addf %147, %150 : vector<2x32xf32>
    %152 = arith.mulf %146, %141 : vector<2x32xf32>
    %cst_68 = arith.constant 1.000000e+00 : f32
    %153 = vector.broadcast %cst_68 : f32 to vector<2x32xf32>
    %154 = arith.subf %153, %146 : vector<2x32xf32>
    %155 = arith.mulf %154, %124 : vector<2x32xf32>
    %156 = arith.addf %152, %155 : vector<2x32xf32>
    %157 = vector.extract_strided_slice %88 {offsets = [0, 2, 0], sizes = [2, 1, 128], strides = [1, 1, 1]} : vector<2x8x128xf32> to vector<2x1x128xf32>
    %158 = vector.shape_cast %157 : vector<2x1x128xf32> to vector<2x128xf32>
    %cst_69 = arith.constant dense<0.000000e+00> : vector<2x128xf32>
    %159 = tpu.matmul %151, %90, %cst_69 {dimension_numbers = #tpu.dot_dimension_numbers<[1], [0], [0], [1], [0, 0, 1, 1], [], []>} : vector<2x32xf32>, vector<32x128xf32>, vector<2x128xf32> -> vector<2x128xf32>
    %160 = arith.addf %158, %159 : vector<2x128xf32>
    %161 = vector.extract_strided_slice %160 {offsets = [0, 0], sizes = [2, 96], strides = [1, 1]} : vector<2x128xf32> to vector<2x96xf32>
    %162 = arith.negf %161 : vector<2x96xf32>
    %163 = math.exp %162 : vector<2x96xf32>
    %cst_70 = arith.constant 1.000000e+00 : f32
    %164 = vector.broadcast %cst_70 : f32 to vector<2x96xf32>
    %165 = arith.addf %164, %163 : vector<2x96xf32>
    %166 = arith.divf %164, %165 : vector<2x96xf32>
    %167 = vector.extract_strided_slice %160 {offsets = [0, 96], sizes = [2, 32], strides = [1, 1]} : vector<2x128xf32> to vector<2x32xf32>
    %168 = math.tanh %167 : vector<2x32xf32>
    %169 = vector.extract_strided_slice %166 {offsets = [0, 32], sizes = [2, 32], strides = [1, 1]} : vector<2x96xf32> to vector<2x32xf32>
    %170 = arith.mulf %169, %156 : vector<2x32xf32>
    %171 = vector.extract_strided_slice %166 {offsets = [0, 0], sizes = [2, 32], strides = [1, 1]} : vector<2x96xf32> to vector<2x32xf32>
    %172 = arith.mulf %171, %168 : vector<2x32xf32>
    %173 = arith.addf %170, %172 : vector<2x32xf32>
    %174 = vector.extract_strided_slice %166 {offsets = [0, 64], sizes = [2, 32], strides = [1, 1]} : vector<2x96xf32> to vector<2x32xf32>
    %175 = math.tanh %173 : vector<2x32xf32>
    %176 = arith.mulf %174, %175 : vector<2x32xf32>
    %177 = vector.extract_strided_slice %89 {offsets = [0, 2, 0], sizes = [2, 1, 32], strides = [1, 1, 1]} : vector<2x8x32xf32> to vector<2x1x32xf32>
    %178 = vector.shape_cast %177 : vector<2x1x32xf32> to vector<2x32xf32>
    %179 = arith.mulf %178, %176 : vector<2x32xf32>
    %cst_71 = arith.constant 1.000000e+00 : f32
    %180 = vector.broadcast %cst_71 : f32 to vector<2x32xf32>
    %181 = arith.subf %180, %178 : vector<2x32xf32>
    %182 = arith.mulf %181, %151 : vector<2x32xf32>
    %183 = arith.addf %179, %182 : vector<2x32xf32>
    %184 = arith.mulf %178, %173 : vector<2x32xf32>
    %cst_72 = arith.constant 1.000000e+00 : f32
    %185 = vector.broadcast %cst_72 : f32 to vector<2x32xf32>
    %186 = arith.subf %185, %178 : vector<2x32xf32>
    %187 = arith.mulf %186, %156 : vector<2x32xf32>
    %188 = arith.addf %184, %187 : vector<2x32xf32>
    %189 = vector.extract_strided_slice %88 {offsets = [0, 3, 0], sizes = [2, 1, 128], strides = [1, 1, 1]} : vector<2x8x128xf32> to vector<2x1x128xf32>
    %190 = vector.shape_cast %189 : vector<2x1x128xf32> to vector<2x128xf32>
    %cst_73 = arith.constant dense<0.000000e+00> : vector<2x128xf32>
    %191 = tpu.matmul %183, %90, %cst_73 {dimension_numbers = #tpu.dot_dimension_numbers<[1], [0], [0], [1], [0, 0, 1, 1], [], []>} : vector<2x32xf32>, vector<32x128xf32>, vector<2x128xf32> -> vector<2x128xf32>
    %192 = arith.addf %190, %191 : vector<2x128xf32>
    %193 = vector.extract_strided_slice %192 {offsets = [0, 0], sizes = [2, 96], strides = [1, 1]} : vector<2x128xf32> to vector<2x96xf32>
    %194 = arith.negf %193 : vector<2x96xf32>
    %195 = math.exp %194 : vector<2x96xf32>
    %cst_74 = arith.constant 1.000000e+00 : f32
    %196 = vector.broadcast %cst_74 : f32 to vector<2x96xf32>
    %197 = arith.addf %196, %195 : vector<2x96xf32>
    %198 = arith.divf %196, %197 : vector<2x96xf32>
    %199 = vector.extract_strided_slice %192 {offsets = [0, 96], sizes = [2, 32], strides = [1, 1]} : vector<2x128xf32> to vector<2x32xf32>
    %200 = math.tanh %199 : vector<2x32xf32>
    %201 = vector.extract_strided_slice %198 {offsets = [0, 32], sizes = [2, 32], strides = [1, 1]} : vector<2x96xf32> to vector<2x32xf32>
    %202 = arith.mulf %201, %188 : vector<2x32xf32>
    %203 = vector.extract_strided_slice %198 {offsets = [0, 0], sizes = [2, 32], strides = [1, 1]} : vector<2x96xf32> to vector<2x32xf32>
    %204 = arith.mulf %203, %200 : vector<2x32xf32>
    %205 = arith.addf %202, %204 : vector<2x32xf32>
    %206 = vector.extract_strided_slice %198 {offsets = [0, 64], sizes = [2, 32], strides = [1, 1]} : vector<2x96xf32> to vector<2x32xf32>
    %207 = math.tanh %205 : vector<2x32xf32>
    %208 = arith.mulf %206, %207 : vector<2x32xf32>
    %209 = vector.extract_strided_slice %89 {offsets = [0, 3, 0], sizes = [2, 1, 32], strides = [1, 1, 1]} : vector<2x8x32xf32> to vector<2x1x32xf32>
    %210 = vector.shape_cast %209 : vector<2x1x32xf32> to vector<2x32xf32>
    %211 = arith.mulf %210, %208 : vector<2x32xf32>
    %cst_75 = arith.constant 1.000000e+00 : f32
    %212 = vector.broadcast %cst_75 : f32 to vector<2x32xf32>
    %213 = arith.subf %212, %210 : vector<2x32xf32>
    %214 = arith.mulf %213, %183 : vector<2x32xf32>
    %215 = arith.addf %211, %214 : vector<2x32xf32>
    %216 = arith.mulf %210, %205 : vector<2x32xf32>
    %cst_76 = arith.constant 1.000000e+00 : f32
    %217 = vector.broadcast %cst_76 : f32 to vector<2x32xf32>
    %218 = arith.subf %217, %210 : vector<2x32xf32>
    %219 = arith.mulf %218, %188 : vector<2x32xf32>
    %220 = arith.addf %216, %219 : vector<2x32xf32>
    %221 = vector.extract_strided_slice %88 {offsets = [0, 4, 0], sizes = [2, 1, 128], strides = [1, 1, 1]} : vector<2x8x128xf32> to vector<2x1x128xf32>
    %222 = vector.shape_cast %221 : vector<2x1x128xf32> to vector<2x128xf32>
    %cst_77 = arith.constant dense<0.000000e+00> : vector<2x128xf32>
    %223 = tpu.matmul %215, %90, %cst_77 {dimension_numbers = #tpu.dot_dimension_numbers<[1], [0], [0], [1], [0, 0, 1, 1], [], []>} : vector<2x32xf32>, vector<32x128xf32>, vector<2x128xf32> -> vector<2x128xf32>
    %224 = arith.addf %222, %223 : vector<2x128xf32>
    %225 = vector.extract_strided_slice %224 {offsets = [0, 0], sizes = [2, 96], strides = [1, 1]} : vector<2x128xf32> to vector<2x96xf32>
    %226 = arith.negf %225 : vector<2x96xf32>
    %227 = math.exp %226 : vector<2x96xf32>
    %cst_78 = arith.constant 1.000000e+00 : f32
    %228 = vector.broadcast %cst_78 : f32 to vector<2x96xf32>
    %229 = arith.addf %228, %227 : vector<2x96xf32>
    %230 = arith.divf %228, %229 : vector<2x96xf32>
    %231 = vector.extract_strided_slice %224 {offsets = [0, 96], sizes = [2, 32], strides = [1, 1]} : vector<2x128xf32> to vector<2x32xf32>
    %232 = math.tanh %231 : vector<2x32xf32>
    %233 = vector.extract_strided_slice %230 {offsets = [0, 32], sizes = [2, 32], strides = [1, 1]} : vector<2x96xf32> to vector<2x32xf32>
    %234 = arith.mulf %233, %220 : vector<2x32xf32>
    %235 = vector.extract_strided_slice %230 {offsets = [0, 0], sizes = [2, 32], strides = [1, 1]} : vector<2x96xf32> to vector<2x32xf32>
    %236 = arith.mulf %235, %232 : vector<2x32xf32>
    %237 = arith.addf %234, %236 : vector<2x32xf32>
    %238 = vector.extract_strided_slice %230 {offsets = [0, 64], sizes = [2, 32], strides = [1, 1]} : vector<2x96xf32> to vector<2x32xf32>
    %239 = math.tanh %237 : vector<2x32xf32>
    %240 = arith.mulf %238, %239 : vector<2x32xf32>
    %241 = vector.extract_strided_slice %89 {offsets = [0, 4, 0], sizes = [2, 1, 32], strides = [1, 1, 1]} : vector<2x8x32xf32> to vector<2x1x32xf32>
    %242 = vector.shape_cast %241 : vector<2x1x32xf32> to vector<2x32xf32>
    %243 = arith.mulf %242, %240 : vector<2x32xf32>
    %cst_79 = arith.constant 1.000000e+00 : f32
    %244 = vector.broadcast %cst_79 : f32 to vector<2x32xf32>
    %245 = arith.subf %244, %242 : vector<2x32xf32>
    %246 = arith.mulf %245, %215 : vector<2x32xf32>
    %247 = arith.addf %243, %246 : vector<2x32xf32>
    %248 = arith.mulf %242, %237 : vector<2x32xf32>
    %cst_80 = arith.constant 1.000000e+00 : f32
    %249 = vector.broadcast %cst_80 : f32 to vector<2x32xf32>
    %250 = arith.subf %249, %242 : vector<2x32xf32>
    %251 = arith.mulf %250, %220 : vector<2x32xf32>
    %252 = arith.addf %248, %251 : vector<2x32xf32>
    %253 = vector.extract_strided_slice %88 {offsets = [0, 5, 0], sizes = [2, 1, 128], strides = [1, 1, 1]} : vector<2x8x128xf32> to vector<2x1x128xf32>
    %254 = vector.shape_cast %253 : vector<2x1x128xf32> to vector<2x128xf32>
    %cst_81 = arith.constant dense<0.000000e+00> : vector<2x128xf32>
    %255 = tpu.matmul %247, %90, %cst_81 {dimension_numbers = #tpu.dot_dimension_numbers<[1], [0], [0], [1], [0, 0, 1, 1], [], []>} : vector<2x32xf32>, vector<32x128xf32>, vector<2x128xf32> -> vector<2x128xf32>
    %256 = arith.addf %254, %255 : vector<2x128xf32>
    %257 = vector.extract_strided_slice %256 {offsets = [0, 0], sizes = [2, 96], strides = [1, 1]} : vector<2x128xf32> to vector<2x96xf32>
    %258 = arith.negf %257 : vector<2x96xf32>
    %259 = math.exp %258 : vector<2x96xf32>
    %cst_82 = arith.constant 1.000000e+00 : f32
    %260 = vector.broadcast %cst_82 : f32 to vector<2x96xf32>
    %261 = arith.addf %260, %259 : vector<2x96xf32>
    %262 = arith.divf %260, %261 : vector<2x96xf32>
    %263 = vector.extract_strided_slice %256 {offsets = [0, 96], sizes = [2, 32], strides = [1, 1]} : vector<2x128xf32> to vector<2x32xf32>
    %264 = math.tanh %263 : vector<2x32xf32>
    %265 = vector.extract_strided_slice %262 {offsets = [0, 32], sizes = [2, 32], strides = [1, 1]} : vector<2x96xf32> to vector<2x32xf32>
    %266 = arith.mulf %265, %252 : vector<2x32xf32>
    %267 = vector.extract_strided_slice %262 {offsets = [0, 0], sizes = [2, 32], strides = [1, 1]} : vector<2x96xf32> to vector<2x32xf32>
    %268 = arith.mulf %267, %264 : vector<2x32xf32>
    %269 = arith.addf %266, %268 : vector<2x32xf32>
    %270 = vector.extract_strided_slice %262 {offsets = [0, 64], sizes = [2, 32], strides = [1, 1]} : vector<2x96xf32> to vector<2x32xf32>
    %271 = math.tanh %269 : vector<2x32xf32>
    %272 = arith.mulf %270, %271 : vector<2x32xf32>
    %273 = vector.extract_strided_slice %89 {offsets = [0, 5, 0], sizes = [2, 1, 32], strides = [1, 1, 1]} : vector<2x8x32xf32> to vector<2x1x32xf32>
    %274 = vector.shape_cast %273 : vector<2x1x32xf32> to vector<2x32xf32>
    %275 = arith.mulf %274, %272 : vector<2x32xf32>
    %cst_83 = arith.constant 1.000000e+00 : f32
    %276 = vector.broadcast %cst_83 : f32 to vector<2x32xf32>
    %277 = arith.subf %276, %274 : vector<2x32xf32>
    %278 = arith.mulf %277, %247 : vector<2x32xf32>
    %279 = arith.addf %275, %278 : vector<2x32xf32>
    %280 = arith.mulf %274, %269 : vector<2x32xf32>
    %cst_84 = arith.constant 1.000000e+00 : f32
    %281 = vector.broadcast %cst_84 : f32 to vector<2x32xf32>
    %282 = arith.subf %281, %274 : vector<2x32xf32>
    %283 = arith.mulf %282, %252 : vector<2x32xf32>
    %284 = arith.addf %280, %283 : vector<2x32xf32>
    %285 = vector.extract_strided_slice %88 {offsets = [0, 6, 0], sizes = [2, 1, 128], strides = [1, 1, 1]} : vector<2x8x128xf32> to vector<2x1x128xf32>
    %286 = vector.shape_cast %285 : vector<2x1x128xf32> to vector<2x128xf32>
    %cst_85 = arith.constant dense<0.000000e+00> : vector<2x128xf32>
    %287 = tpu.matmul %279, %90, %cst_85 {dimension_numbers = #tpu.dot_dimension_numbers<[1], [0], [0], [1], [0, 0, 1, 1], [], []>} : vector<2x32xf32>, vector<32x128xf32>, vector<2x128xf32> -> vector<2x128xf32>
    %288 = arith.addf %286, %287 : vector<2x128xf32>
    %289 = vector.extract_strided_slice %288 {offsets = [0, 0], sizes = [2, 96], strides = [1, 1]} : vector<2x128xf32> to vector<2x96xf32>
    %290 = arith.negf %289 : vector<2x96xf32>
    %291 = math.exp %290 : vector<2x96xf32>
    %cst_86 = arith.constant 1.000000e+00 : f32
    %292 = vector.broadcast %cst_86 : f32 to vector<2x96xf32>
    %293 = arith.addf %292, %291 : vector<2x96xf32>
    %294 = arith.divf %292, %293 : vector<2x96xf32>
    %295 = vector.extract_strided_slice %288 {offsets = [0, 96], sizes = [2, 32], strides = [1, 1]} : vector<2x128xf32> to vector<2x32xf32>
    %296 = math.tanh %295 : vector<2x32xf32>
    %297 = vector.extract_strided_slice %294 {offsets = [0, 32], sizes = [2, 32], strides = [1, 1]} : vector<2x96xf32> to vector<2x32xf32>
    %298 = arith.mulf %297, %284 : vector<2x32xf32>
    %299 = vector.extract_strided_slice %294 {offsets = [0, 0], sizes = [2, 32], strides = [1, 1]} : vector<2x96xf32> to vector<2x32xf32>
    %300 = arith.mulf %299, %296 : vector<2x32xf32>
    %301 = arith.addf %298, %300 : vector<2x32xf32>
    %302 = vector.extract_strided_slice %294 {offsets = [0, 64], sizes = [2, 32], strides = [1, 1]} : vector<2x96xf32> to vector<2x32xf32>
    %303 = math.tanh %301 : vector<2x32xf32>
    %304 = arith.mulf %302, %303 : vector<2x32xf32>
    %305 = vector.extract_strided_slice %89 {offsets = [0, 6, 0], sizes = [2, 1, 32], strides = [1, 1, 1]} : vector<2x8x32xf32> to vector<2x1x32xf32>
    %306 = vector.shape_cast %305 : vector<2x1x32xf32> to vector<2x32xf32>
    %307 = arith.mulf %306, %304 : vector<2x32xf32>
    %cst_87 = arith.constant 1.000000e+00 : f32
    %308 = vector.broadcast %cst_87 : f32 to vector<2x32xf32>
    %309 = arith.subf %308, %306 : vector<2x32xf32>
    %310 = arith.mulf %309, %279 : vector<2x32xf32>
    %311 = arith.addf %307, %310 : vector<2x32xf32>
    %312 = arith.mulf %306, %301 : vector<2x32xf32>
    %cst_88 = arith.constant 1.000000e+00 : f32
    %313 = vector.broadcast %cst_88 : f32 to vector<2x32xf32>
    %314 = arith.subf %313, %306 : vector<2x32xf32>
    %315 = arith.mulf %314, %284 : vector<2x32xf32>
    %316 = arith.addf %312, %315 : vector<2x32xf32>
    %317 = vector.extract_strided_slice %88 {offsets = [0, 7, 0], sizes = [2, 1, 128], strides = [1, 1, 1]} : vector<2x8x128xf32> to vector<2x1x128xf32>
    %318 = vector.shape_cast %317 : vector<2x1x128xf32> to vector<2x128xf32>
    %cst_89 = arith.constant dense<0.000000e+00> : vector<2x128xf32>
    %319 = tpu.matmul %311, %90, %cst_89 {dimension_numbers = #tpu.dot_dimension_numbers<[1], [0], [0], [1], [0, 0, 1, 1], [], []>} : vector<2x32xf32>, vector<32x128xf32>, vector<2x128xf32> -> vector<2x128xf32>
    %320 = arith.addf %318, %319 : vector<2x128xf32>
    %321 = vector.extract_strided_slice %320 {offsets = [0, 0], sizes = [2, 96], strides = [1, 1]} : vector<2x128xf32> to vector<2x96xf32>
    %322 = arith.negf %321 : vector<2x96xf32>
    %323 = math.exp %322 : vector<2x96xf32>
    %cst_90 = arith.constant 1.000000e+00 : f32
    %324 = vector.broadcast %cst_90 : f32 to vector<2x96xf32>
    %325 = arith.addf %324, %323 : vector<2x96xf32>
    %326 = arith.divf %324, %325 : vector<2x96xf32>
    %327 = vector.extract_strided_slice %320 {offsets = [0, 96], sizes = [2, 32], strides = [1, 1]} : vector<2x128xf32> to vector<2x32xf32>
    %328 = math.tanh %327 : vector<2x32xf32>
    %329 = vector.extract_strided_slice %326 {offsets = [0, 32], sizes = [2, 32], strides = [1, 1]} : vector<2x96xf32> to vector<2x32xf32>
    %330 = arith.mulf %329, %316 : vector<2x32xf32>
    %331 = vector.extract_strided_slice %326 {offsets = [0, 0], sizes = [2, 32], strides = [1, 1]} : vector<2x96xf32> to vector<2x32xf32>
    %332 = arith.mulf %331, %328 : vector<2x32xf32>
    %333 = arith.addf %330, %332 : vector<2x32xf32>
    %334 = vector.extract_strided_slice %326 {offsets = [0, 64], sizes = [2, 32], strides = [1, 1]} : vector<2x96xf32> to vector<2x32xf32>
    %335 = math.tanh %333 : vector<2x32xf32>
    %336 = arith.mulf %334, %335 : vector<2x32xf32>
    %337 = vector.extract_strided_slice %89 {offsets = [0, 7, 0], sizes = [2, 1, 32], strides = [1, 1, 1]} : vector<2x8x32xf32> to vector<2x1x32xf32>
    %338 = vector.shape_cast %337 : vector<2x1x32xf32> to vector<2x32xf32>
    %339 = arith.mulf %338, %336 : vector<2x32xf32>
    %cst_91 = arith.constant 1.000000e+00 : f32
    %340 = vector.broadcast %cst_91 : f32 to vector<2x32xf32>
    %341 = arith.subf %340, %338 : vector<2x32xf32>
    %342 = arith.mulf %341, %311 : vector<2x32xf32>
    %343 = arith.addf %339, %342 : vector<2x32xf32>
    %c0_92 = arith.constant 0 : index
    %c0_93 = arith.constant 0 : index
    %344 = vector.load %arg9[%c0_92, %c0_93] : memref<32x64xf32, #tpu.memory_space<vmem>>, vector<32x64xf32>
    %cst_94 = arith.constant dense<0.000000e+00> : vector<2x64xf32>
    %345 = tpu.matmul %343, %344, %cst_94 {dimension_numbers = #tpu.dot_dimension_numbers<[1], [0], [0], [1], [0, 0, 1, 1], [], []>} : vector<2x32xf32>, vector<32x64xf32>, vector<2x64xf32> -> vector<2x64xf32>
    %346 = arith.addf %80, %345 : vector<2x64xf32>
    %c0_95 = arith.constant 0 : index
    %c0_96 = arith.constant 0 : index
    %347 = vector.load %arg10[%c0_95, %c0_96] : memref<1x64xf32, #tpu.memory_space<vmem>>, vector<1x64xf32>
    %348 = vector.broadcast %347 : vector<1x64xf32> to vector<2x64xf32>
    %349 = arith.addf %346, %348 : vector<2x64xf32>
    %cst_97 = arith.constant 0.000000e+00 : f32
    %350 = vector.broadcast %cst_97 : f32 to vector<2x64xf32>
    %351 = arith.maximumf %349, %350 : vector<2x64xf32>
    %c0_98 = arith.constant 0 : index
    %c0_99 = arith.constant 0 : index
    %352 = vector.load %arg11[%c0_98, %c0_99] : memref<64x128xf32, #tpu.memory_space<vmem>>, vector<64x128xf32>
    %cst_100 = arith.constant dense<0.000000e+00> : vector<2x128xf32>
    %353 = tpu.matmul %351, %352, %cst_100 {dimension_numbers = #tpu.dot_dimension_numbers<[1], [0], [0], [1], [0, 0, 1, 1], [], []>} : vector<2x64xf32>, vector<64x128xf32>, vector<2x128xf32> -> vector<2x128xf32>
    %c0_101 = arith.constant 0 : index
    %c0_102 = arith.constant 0 : index
    %354 = vector.load %arg12[%c0_101, %c0_102] : memref<1x128xf32, #tpu.memory_space<vmem>>, vector<1x128xf32>
    %355 = vector.broadcast %354 : vector<1x128xf32> to vector<2x128xf32>
    %356 = arith.addf %353, %355 : vector<2x128xf32>
    %c0_103 = arith.constant 0 : index
    %c0_104 = arith.constant 0 : index
    %357 = vector.load %arg13[%c0_103, %c0_104] : memref<2x128xf32, #tpu.memory_space<vmem>>, vector<2x128xf32>
    tpu.vector_store %arg13[%c0_103, %c0_104], %356 {strides = array<i32>} : memref<2x128xf32, #tpu.memory_space<vmem>>, vector<2x128xf32>,
    return
  }
}

</mosaic_0001>

<bundles_post_ra>
// kernel: tpu_custom_call.1
= control target key start
LH: loop header
LB: loop body
LE: loop exit
PB: predicated region body
PF: predicated region fallthrough
CT: control target
= control target key end

     0   :  { %18 = vsyncpa [#allocation3], 0  ;;  %s5248_s0 = inlined_call_operand.vmem [shape: f32[40,32], index: 0, kind: input, shape index: {}]   ;;  %s5249_s1 = inlined_call_operand.hbm [shape: f32[2,8,64], index: 1, kind: input, shape index: {}]   ;;  %s5250_s2 = inlined_call_operand.hbm [shape: f32[2,8,32], index: 2, kind: input, shape index: {}]   ;;  %s5251_s3 = inlined_call_operand.vmem [shape: f32[9,32,48], index: 3, kind: input, shape index: {}]   ;;  %s5252_s4 = inlined_call_operand.vmem [shape: f32[1,48], index: 4, kind: input, shape index: {}]   ;;  %s5253_s5 = inlined_call_operand.vmem [shape: f32[192,64], index: 5, kind: input, shape index: {}]   ;;  %s5254_s6 = inlined_call_operand.vmem [shape: f32[64,128], index: 6, kind: input, shape index: {}]   ;;  %s5255_s7 = inlined_call_operand.hbm [shape: f32[32,128], index: 7, kind: input, shape index: {}]   ;;  %s5256_s8 = inlined_call_operand.vmem [shape: f32[1,128], index: 8, kind: input, shape index: {}]   ;;  %s5257_s9 = inlined_call_operand.hbm [shape: f32[32,64], index: 9, kind: input, shape index: {}]   ;;  %s5258_s10 = inlined_call_operand.vmem [shape: f32[1,64], index: 10, kind: input, shape index: {}]   ;;  %s5259_s11 = inlined_call_operand.vmem [shape: f32[64,128], index: 11, kind: input, shape index: {}]   ;;  %s5260_s12 = inlined_call_operand.vmem [shape: f32[1,128], index: 12, kind: input, shape index: {}]   ;;  %s5261_s13 = inlined_call_operand.hbm [shape: f32[2,128], index: 13, kind: output, shape index: {}]  }
   0x1   :  { %19 = vsyncpa [#allocation6], 0 }
   0x2   :  { %20 = vsyncpa [#allocation9], 0 }
   0x3   :  { %21 = vsyncpa [#allocation4], 0  ;;  %s4129_s25 = smov [#allocation5]   ;;  %s4130_s27 = smov [#allocation2]  }
   0x4   :  { %s41_s26 = sshll.u32 %s4129_s25, 4  ;;  %s29_s28 = sshll.u32 %s4130_s27, 4  ;;  %s42_s26 = int_to_ptr.vmem [resolvable:$true] %s41_s26  ;;  %s4216_s28 = int_to_ptr.vmem [resolvable:$true] %s29_s28 }
   0x5   :  { %s4011_s14 = scalar_lea.hbm %s5250_s2, 256 }
   0x6   :  { %p4012_p0 = scmp.ne.s32.totalorder %s5250_s2, %s4011_s14  ;;  %p4015_p1 = scmp.lt.u32.totalorder %s4011_s14, %s5250_s2 }
   0x8   :  { %p4017_p2 = pnand %p4015_p1, %p4012_p0 }
   0xa   :  { %4020 = shalt.err (!%p4017_p2)
}
   0xb   :  { %s4021_s19 = scalar_lea.vmem %s42_s26, 256  ;;  %p4026_p4 = scmp.lt.s32.totalorder %s42_s26, %s42_s26 }
   0xc   :  { %p4022_p3 = scmp.ne.s32.totalorder %s42_s26, %s4021_s19  ;;  %p4027_p5 = scmp.lt.s32.totalorder %s4021_s19, %s4021_s19 }
   0xe   :  { %p4028_p6 = por %p4027_p5, %p4026_p4 }
  0x10   :  { %p4029_p7 = pnand %p4028_p6, %p4022_p3 }
  0x12   :  { %4032 = shalt.err (!%p4029_p7)
}
  0x13   :  { %s4131_s20 = smov 128   ;;  %s4132_s21 = smov 8  }
  0x14   :  { %47 = dma.hbm_to_vmem [thread:$0]  %s5250_s2, 256, %s42_s26, [#allocation6], %s4131_s20, %s4131_s20, %s4132_s21  }
  0x15   :  { %s4033_s27 = scalar_lea.hbm %s5249_s1, 256 }
  0x16   :  { %p4034_p8 = scmp.ne.s32.totalorder %s5249_s1, %s4033_s27  ;;  %p4037_p9 = scmp.lt.u32.totalorder %s4033_s27, %s5249_s1 }
  0x18   :  { %p4039_p10 = pnand %p4037_p9, %p4034_p8 }
  0x1a   :  { %4042 = shalt.err (!%p4039_p10)
}
  0x1b   :  { %s4043_s16 = scalar_lea.vmem %s4216_s28, 256  ;;  %p4048_p12 = scmp.lt.s32.totalorder %s4216_s28, %s4216_s28 }
  0x1c   :  { %p4044_p11 = scmp.ne.s32.totalorder %s4216_s28, %s4043_s16  ;;  %p4049_p13 = scmp.lt.s32.totalorder %s4043_s16, %s4043_s16 }
  0x1e   :  { %p4050_p0 = por %p4049_p13, %p4048_p12 }
  0x20   :  { %p4051_p1 = pnand %p4050_p0, %p4044_p11 }
  0x22   :  { %4054 = shalt.err (!%p4051_p1)
}
  0x23   :  { %35 = dma.hbm_to_vmem [thread:$0]  %s5249_s1, 256, %s4216_s28, [#allocation3], %s4131_s20, %s4131_s20, %s4132_s21  }
  0x24   :  { %s4133_s17 = smov [#allocation7]   ;;  %s4134_s19 = smov [#allocation8]  }
  0x25   :  { %s61_s18 = sshll.u32 %s4133_s17, 4  ;;  %s75_s22 = sshll.u32 %s4134_s19, 4  ;;  %s62_s18 = int_to_ptr.vmem [resolvable:$true] %s61_s18  ;;  %s4253_s22 = int_to_ptr.vmem [resolvable:$true] %s75_s22 }
  0x26   :  { %s4055_s25 = scalar_lea.hbm %s5255_s7, 512 }
  0x27   :  { %p4056_p2 = scmp.ne.s32.totalorder %s5255_s7, %s4055_s25  ;;  %p4059_p3 = scmp.lt.u32.totalorder %s4055_s25, %s5255_s7 }
  0x29   :  { %p4061_p4 = pnand %p4059_p3, %p4056_p2 }
  0x2b   :  { %4064 = shalt.err (!%p4061_p4)
}
  0x2c   :  { %s4065_s1 = scalar_lea.vmem %s62_s18, 512  ;;  %p4070_p6 = scmp.lt.s32.totalorder %s62_s18, %s62_s18 }
  0x2d   :  { %p4066_p5 = scmp.ne.s32.totalorder %s62_s18, %s4065_s1  ;;  %p4071_p7 = scmp.lt.s32.totalorder %s4065_s1, %s4065_s1 }
  0x2f   :  { %p4072_p8 = por %p4071_p7, %p4070_p6 }
  0x31   :  { %p4073_p9 = pnand %p4072_p8, %p4066_p5 }
  0x33   :  { %4076 = shalt.err (!%p4073_p9)
}
  0x34   :  { %67 = dma.hbm_to_vmem [thread:$0]  %s5255_s7, 512, %s62_s18, [#allocation6], %s4131_s20, %s4131_s20, %s4132_s21  }
  0x35   :  { %s4077_s26 = scalar_lea.hbm %s5257_s9, 512 }
  0x36   :  { %p4078_p10 = scmp.ne.s32.totalorder %s5257_s9, %s4077_s26  ;;  %p4081_p11 = scmp.lt.u32.totalorder %s4077_s26, %s5257_s9 }
  0x38   :  { %p4083_p12 = pnand %p4081_p11, %p4078_p10 }
  0x3a   :  { %4086 = shalt.err (!%p4083_p12)
}
  0x3b   :  { %s4087_s25 = scalar_lea.vmem %s4253_s22, 512  ;;  %p4092_p0 = scmp.lt.s32.totalorder %s4253_s22, %s4253_s22 }
  0x3c   :  { %p4088_p13 = scmp.ne.s32.totalorder %s4253_s22, %s4087_s25  ;;  %p4093_p1 = scmp.lt.s32.totalorder %s4087_s25, %s4087_s25 }
  0x3e   :  { %p4094_p2 = por %p4093_p1, %p4092_p0 }
  0x40   :  { %p4095_p3 = pnand %p4094_p2, %p4088_p13 }
  0x42   :  { %4098 = shalt.err (!%p4095_p3)
}
  0x43   :  { %81 = dma.hbm_to_vmem [thread:$0]  %s5257_s9, 512, %s4253_s22, [#allocation9], %s4131_s20, %s4131_s20, %s4132_s21  }
  0x44   :  { %4121 = dma.done.wait [#allocation3], 256  }
  0x45   :  { %4122 = vsyncadd [#allocation3], 4294967040 }
  0x46   :  { %4123 = dma.done.wait [#allocation6], 768  }
  0x47   :  { %4124 = vsyncadd [#allocation6], 4294966528 }
  0x48   :  { %4125 = dma.done.wait [#allocation9], 512  }
  0x49   :  { %4126 = vsyncadd [#allocation9], 4294966784  ;;  %v3138_v0 = vld [vmem:[%s5251_s3 + $0x20] sm:$0xff]  ;;  %v3139_v1 = vld [vmem:[%s5251_s3 + $0x28] sm:$0xff]  ;;  %vm119_vm0 = vcmask 1046528   ;;  %vm321_vm1 = vcmask 1045504  }
  0x4a   :  { %v3150_v2 = vld [vmem:[%s5251_s3 + $0x40] sm:$0xff]  ;;  %v3637_v3 = vpack.c.bf16 %v3139_v1, %v3138_v0  ;;  %v3151_v4 = vld [vmem:[%s5251_s3 + $0x48] sm:$0xff]  ;;  %v3140_v5 = vld [vmem:[%s5251_s3 + $0x30] sm:$0xff]  ;;  %vm129_vm2 = vcmask 261120   ;;  %vm433_vm3 = vcmask 1044480   ;;  %vm545_vm4 = vcmask 1043456  }
  0x4b   :  { %v3141_v6 = vld [vmem:[%s5251_s3 + $0x38] sm:$0xff]  ;;  %v3653_v7 = vpack.c.bf16 %v3151_v4, %v3150_v2  ;;  %v3152_v9 = vld [vmem:[%s5251_s3 + $0x50] sm:$0xff]  ;;  %v4317_v11 = vld [vmem:[%s5248_s0] sm:$0xff]  ;;  %vm1363_vm5 = vcmask 523264   ;;  %vm657_vm6 = vcmask 1042432   ;;  %vm769_vm7 = vcmask 1041408  }
  0x4c   :  { %v3641_v8 = vpack.c.bf16 %v3141_v6, %v3140_v5  ;;  %v3153_v10 = vld [vmem:[%s5251_s3 + $0x58] sm:$0xff]  ;;  %3638 = vmatprep.subr.bf16.mxu1 %v3637_v3  ;;  %v4322_v13 = vld [vmem:[%s5248_s0 + $0x8] sm:$0xff]  ;;  %v120_v14 = vrot.slane %v4317_v11, 1  ;;  %v322_v15 = vrot.slane %v4317_v11, 2  ;;  %v4329_v16 = vld [vmem:[%s5248_s0 + $0x10] sm:$0xff]  ;;  %v434_v45 = vrot.slane %v4317_v11, 3 }
  0x4d   :  { %v3657_v12 = vpack.c.bf16 %v3153_v10, %v3152_v9  ;;  %v105_v17 = vld [vmem:[%s5251_s3] sm:$0xff]  ;;  %3654 = vmatprep.subr.bf16.mxu0 %v3653_v7  ;;  %3640 = vmatpush3.bf16.msra.mxu1 %v3637_v3  ;;  %v121_v18 = vrot.slane %v4322_v13, 1  ;;  %v323_v19 = vrot.slane %v4322_v13, 2  ;;  %v123_v20 = vrot.slane %v4329_v16, 1  ;;  %v106_v21 = vld [vmem:[%s5251_s3 + $0x8] sm:$0xff]  ;;  %v4350_v26 = vld [vmem:[%s5248_s0 + $0x18] sm:$0xff] }
  0x4e   :  { %v3158_v22 = vld [vmem:[%s5251_s3 + $0x60] sm:$0xff]  ;;  %3656 = vmatpush3.bf16.msra.mxu0 %v3653_v7  ;;  %3642 = vmatprep.subr.bf16.mxu1 %v3641_v8  ;;  %v3645_v23 = vpack.c.bf16 %v106_v21, %v105_v17  ;;  %v325_v24 = vrot.slane %v4329_v16, 2  ;;  %v3159_v25 = vld [vmem:[%s5251_s3 + $0x68] sm:$0xff]  ;;  %v125_v31 = vrot.slane %v4350_v26, 1  ;;  %v327_v32 = vrot.slane %v4350_v26, 2  ;;  %v107_v33 = vld [vmem:[%s5251_s3 + $0x10] sm:$0xff] }
  0x4f   :  { %v4355_v27 = vld [vmem:[%s5248_s0 + $0x20] sm:$0xff]  ;;  %3658 = vmatprep.subr.bf16.mxu0 %v3657_v12  ;;  %v122_v28 = vsel %vm119_vm0, %v120_v14, %v121_v18  ;;  %v324_v29 = vsel %vm321_vm1, %v322_v15, %v323_v19  ;;  %v3661_v30 = vpack.c.bf16 %v3159_v25, %v3158_v22  ;;  %v108_v34 = vld [vmem:[%s5251_s3 + $0x18] sm:$0xff]  ;;  %v124_v35 = vsel %vm119_vm0, %v121_v18, %v123_v20  ;;  %v3160_v37 = vld [vmem:[%s5251_s3 + $0x70] sm:$0xff]  ;;  %s4138_s16 = smov 32   ;;  %s4140_s2 = smov 96  }
  0x50   :  { %3382 = vmatprep.mubr.msk.f32.mxu1 %vm129_vm2, %v122_v28  ;;  %3410 = vmatprep.mubr.msk.f32.mxu0 %vm129_vm2, %v324_v29  ;;  %v127_v36 = vrot.slane %v4355_v27, 1  ;;  %v3161_v38 = vld [vmem:[%s5251_s3 + $0x78] sm:$0xff]  ;;  %v326_v39 = vsel %vm321_vm1, %v323_v19, %v325_v24  ;;  %v329_v40 = vrot.slane %v4355_v27, 2  ;;  %v126_v41 = vsel %vm119_vm0, %v123_v20, %v125_v31  ;;  %v3166_v47 = vld [vmem:[%s5251_s3 + $0x80] sm:$0xff]  ;;  %v3167_v48 = vld [vmem:[%s5251_s3 + $0x88] sm:$0xff]  ;;  %s4141_s14 = smov 16  }
  0x51   :  { %3644 = vmatpush3.bf16.msra.mxu1 %v3641_v8  ;;  %v3649_v42 = vpack.c.bf16 %v108_v34, %v107_v33  ;;  %v328_v43 = vsel %vm321_vm1, %v325_v24, %v327_v32  ;;  %v3665_v44 = vpack.c.bf16 %v3161_v38, %v3160_v37  ;;  %v435_v46 = vrot.slane %v4322_v13, 3  ;;  %v1400_v50 = vld [vmem:[%s5254_s6] sm:$0xff]  ;;  %v1401_v51 = vld [vmem:[%s5254_s6 + $0x8] sm:$0xff]  ;;  %v3168_v58 = vld [vmem:[%s5251_s3 + $0x90] sm:$0xff]  ;;  %s4142_s21 = smov 48   ;;  %s4143_s15 = smov 112  }
  0x52   :  { %3660 = vmatpush3.bf16.msra.mxu0 %v3657_v12  ;;  %3646 = vmatprep.subr.bf16.mxu1 %v3645_v23  ;;  %v128_v49 = vsel %vm119_vm0, %v125_v31, %v127_v36  ;;  %v330_v52 = vsel %vm321_vm1, %v327_v32, %v329_v40  ;;  %v437_v53 = vrot.slane %v4329_v16, 3  ;;  %v3669_v54 = vpack.c.bf16 %v3167_v48, %v3166_v47  ;;  %v3169_v59 = vld [vmem:[%s5251_s3 + $0x98] sm:$0xff]  ;;  %v1402_v60 = vld [vmem:[%s5254_s6 + $0x10] sm:$0xff]  ;;  %v3174_v3 = vld [vmem:[%s5251_s3 + $0xa0] sm:$0xff] }
  0x53   :  { %3662 = vmatprep.subr.bf16.mxu0 %v3661_v30  ;;  %v436_v55 = vsel %vm433_vm3, %v434_v45, %v435_v46  ;;  %v3709_v56 = vpack.c.bf16 %v1401_v51, %v1400_v50  ;;  %v439_v57 = vrot.slane %v4350_v26, 3  ;;  %v1403_v61 = vld [vmem:[%s5254_s6 + $0x18] sm:$0xff]  ;;  %v441_v63 = vrot.slane %v4355_v27, 3  ;;  %v3175_v6 = vld [vmem:[%s5251_s3 + $0xa8] sm:$0xff]  ;;  %v1404_v7 = vld [vmem:[%s5254_s6 + $0x20] sm:$0xff] }
  0x54   :  { %3383 = vmatmul.mubr.msk.f32.vlgmr.msra.gmra.mrb[0].mxu1 %vm129_vm2, %v124_v35  ;;  %v438_v62 = vsel %vm433_vm3, %v435_v46, %v437_v53  ;;  %v3673_v0 = vpack.c.bf16 %v3169_v59, %v3168_v58  ;;  %v546_v1 = vrot.slane %v4317_v11, 4  ;;  %v547_v2 = vrot.slane %v4322_v13, 4  ;;  %v1405_v8 = vld [vmem:[%s5254_s6 + $0x28] sm:$0xff]  ;;  %v3176_v18 = vld [vmem:[%s5251_s3 + $0xb0] sm:$0xff]  ;;  %v3177_v19 = vld [vmem:[%s5251_s3 + $0xb8] sm:$0xff] }
  0x55   :  { %3411 = vmatmul.mubr.msk.f32.vlgmr.msra.gmra.mrb[0].mxu0 %vm129_vm2, %v326_v39  ;;  %3648 = vmatpush3.bf16.msra.mxu1 %v3645_v23  ;;  %v440_v4 = vsel %vm433_vm3, %v437_v53, %v439_v57  ;;  %v3713_v5 = vpack.c.bf16 %v1403_v61, %v1402_v60  ;;  %v442_v9 = vsel %vm433_vm3, %v439_v57, %v441_v63  ;;  %v549_v10 = vrot.slane %v4329_v16, 4  ;;  %v1406_v20 = vld [vmem:[%s5254_s6 + $0x30] sm:$0xff]  ;;  %v1407_v21 = vld [vmem:[%s5254_s6 + $0x38] sm:$0xff]  ;;  %v1398_v22 = vld [vmem:[#allocation2] sm:$0xff] }
  0x56   :  { %3664 = vmatpush3.bf16.msra.mxu0 %v3661_v30  ;;  %3385 = vmatprep.mubr.msk.f32.mxu1 %vm129_vm2, %v126_v41  ;;  %v548_v12 = vsel %vm545_vm4, %v546_v1, %v547_v2  ;;  %v3677_v14 = vpack.c.bf16 %v3175_v6, %v3174_v3  ;;  %v3717_v15 = vpack.c.bf16 %v1405_v8, %v1404_v7  ;;  %v551_v17 = vrot.slane %v4350_v26, 4  ;;  %v3182_v32 = vld [vmem:[%s5251_s3 + $0xc0] sm:$0xff]  ;;  %v3183_v33 = vld [vmem:[%s5251_s3 + $0xc8] sm:$0xff]  ;;  %v1499_v37 = vld [vmem:[#allocation7 + $0x8] sm:$0xff] }
  0x57   :  { %3413 = vmatprep.mubr.msk.f32.mxu0 %vm129_vm2, %v328_v43  ;;  %3650 = vmatprep.subr.bf16.mxu1 %v3649_v42  ;;  %v550_v23 = vsel %vm545_vm4, %v547_v2, %v549_v10  ;;  %v553_v24 = vrot.slane %v4355_v27, 4  ;;  %v3681_v25 = vpack.c.bf16 %v3177_v19, %v3176_v18  ;;  %v3721_v29 = vpack.c.bf16 %v1407_v21, %v1406_v20  ;;  %v1498_v36 = vld [vmem:[#allocation7] sm:$0xff]  ;;  %v3184_v41 = vld [vmem:[%s5251_s3 + $0xd0] sm:$0xff]  ;;  %v1500_v47 = vld [vmem:[#allocation7 + $0x10] sm:$0xff] }
  0x58   :  { %3386 = vmatmul.mubr.msk.f32.gmra.mrb[2].mxu1 %vm129_vm2, %v128_v49  ;;  %3666 = vmatprep.subr.bf16.mxu0 %v3665_v44  ;;  %v552_v28 = vsel %vm545_vm4, %v549_v10, %v551_v17  ;;  %v658_v30 = vrot.slane %v4317_v11, 5  ;;  %v659_v31 = vrot.slane %v4322_v13, 5  ;;  %v661_v35 = vrot.slane %v4329_v16, 5  ;;  %v1399_v43 = vld [vmem:[#allocation2 + $0x8] sm:$0xff]  ;;  %v1501_v48 = vld [vmem:[#allocation7 + $0x18] sm:$0xff]  ;;  %v3199_v8 = vld [vmem:[%s5251_s3 + $0x108] sm:$0xff] }
  0x59   :  { %3414 = vmatmul.mubr.msk.f32.gmra.mrb[2].mxu0 %vm129_vm2, %v330_v52  ;;  %3652 = vmatpush3.bf16.msra.mxu1 %v3649_v42  ;;  %v554_v34 = vsel %vm545_vm4, %v551_v17, %v553_v24  ;;  %v3685_v39 = vpack.c.bf16 %v3183_v33, %v3182_v32  ;;  %v663_v40 = vrot.slane %v4350_v26, 5  ;;  %v3185_v42 = vld [vmem:[%s5251_s3 + $0xd8] sm:$0xff]  ;;  %v665_v46 = vrot.slane %v4355_v27, 5  ;;  %v3192_v63 = vld [vmem:[%s5251_s3 + $0xf0] sm:$0xff]  ;;  %v3198_v7 = vld [vmem:[%s5251_s3 + $0x100] sm:$0xff] }
  0x5a   :  { %3668 = vmatpush3.bf16.msra.mxu0 %v3665_v44  ;;  %3396 = vmatprep.mubr.msk.f32.mxu1 %vm129_vm2, %v4317_v11  ;;  %v660_v38 = vsel %vm657_vm6, %v658_v30, %v659_v31  ;;  %v4489_v44 = vpack.c.bf16 %v1499_v37, %v1498_v36  ;;  %v662_v45 = vsel %vm657_vm6, %v659_v31, %v661_v35  ;;  %v4135_v49 = vmov 0.0|0.0   ;;  %v3201_v17 = vld [vmem:[%s5251_s3 + $0x118] sm:$0xff]  ;;  %v3206_v37 = vld [vmem:[%s5252_s4] ss:$0 sm:$0xff]  ;;  %s4139_s4 = smov 64  }
  0x5b   :  { %3424 = vmatprep.mubr.msk.f32.mxu0 %vm129_vm2, %v436_v55  ;;  %3670 = vmatprep.subr.bf16.mxu0 %v3669_v54  ;;  %v664_v50 = vsel %vm657_vm6, %v661_v35, %v663_v40  ;;  %v3689_v51 = vpack.c.bf16 %v3185_v42, %v3184_v41  ;;  %v770_v52 = vrot.slane %v4317_v11, 6  ;;  %v771_v53 = vrot.slane %v4322_v13, 6  ;;  %v3191_v55 = vld [vmem:[%s5251_s3 + $0xe8] sm:$0xff] }
  0x5c   :  { %3397 = vmatmul.mubr.msk.f32.vlgmr.msra.gmra.mrb[0].mxu1 %vm129_vm2, %v4322_v13  ;;  %3710 = vmatprep.subr.bf16.mxu1 %v3709_v56  ;;  %v666_v57 = vsel %vm657_vm6, %v663_v40, %v665_v46  ;;  %v773_v58 = vrot.slane %v4329_v16, 6  ;;  %v775_v61 = vrot.slane %v4350_v26, 6  ;;  %vm4136_vm8 = vmmov 0  }
  0x5d   :  { %3425 = vmatmul.mubr.msk.f32.vlgmr.msra.gmra.mrb[0].mxu0 %vm129_vm2, %v438_v62  ;;  %3712 = vmatpush3.bf16.msra.mxu1 %v3709_v56  ;;  %v4507_v56 = vpack.c.bf16 %v1501_v48, %v1500_v47  ;;  %v772_v59 = vsel %vm769_vm7, %v770_v52, %v771_v53  ;;  %v4137_v62 = vmov 0.0   ;;  %v777_v2 = vrot.slane %v4355_v27, 6 }
  0x5e   :  { %3672 = vmatpush3.bf16.msra.mxu0 %v3669_v54  ;;  %3399 = vmatprep.mubr.msk.f32.mxu1 %vm129_vm2, %v4329_v16  ;;  %v3190_v54 = vld [vmem:[%s5251_s3 + $0xe0] sm:$0xff]  ;;  %v774_v1 = vsel %vm769_vm7, %v771_v53, %v773_v58  ;;  %v776_v3 = vsel %vm769_vm7, %v773_v58, %v775_v61  ;;  %v883_v6 = vrot.slane %v4322_v13, 7  ;;  %vm881_vm9 = vcmask 1040384  }
  0x5f   :  { %3427 = vmatprep.mubr.msk.f32.mxu0 %vm129_vm2, %v440_v4  ;;  %3674 = vmatprep.subr.bf16.mxu0 %v3673_v0  ;;  %v3693_v60 = vpack.c.bf16 %v3191_v55, %v3190_v54  ;;  %v889_v19 = vrot.slane %v4355_v27, 7  ;;  %vm1131_vm10 = vcmask 124928   ;;  %vm1149_vm11 = vcmask 128002  }
  0x60   :  { %3400 = vmatmul.mubr.msk.f32.gmra.mrb[2].mxu1 %vm129_vm2, %v4350_v26  ;;  %3714 = vmatprep.subr.bf16.mxu1 %v3713_v5  ;;  %vm1214_vm12 = vcmask 257153   ;;  %vm1129_vm13 = vcmask 130055   ;;  %vm1114_vm14 = vcmask 129027   ;;  %vm1229_vm15 = vcmask 386304  }
  0x61   :  { %3428 = vmatmul.mubr.msk.f32.gmra.mrb[2].mxu0 %vm129_vm2, %v442_v9  ;;  %3716 = vmatpush3.bf16.msra.mxu1 %v3713_v5  ;;  %v882_v5 = vrot.slane %v4317_v11, 7  ;;  %v778_v11 = vsel %vm769_vm7, %v775_v61, %v777_v2  ;;  %v885_v9 = vrot.slane %v4329_v16, 7  ;;  %vm1164_vm0 = vcmask 256128  }
  0x62   :  { %3676 = vmatpush3.bf16.msra.mxu0 %v3673_v0  ;;  %3438 = vmatprep.mubr.msk.f32.mxu0 %vm129_vm2, %v548_v12  ;;  %v3193_v0 = vld [vmem:[%s5251_s3 + $0xf8] sm:$0xff]  ;;  %v3701_v12 = vpack.c.bf16 %v3199_v8, %v3198_v7  ;;  %vm1196_vm1 = vcmask 254080   ;;  %vm1244_vm3 = vcmask 388354   ;;  %vm1291_vm4 = vcmask 1041409  }
  0x63   :  { %3678 = vmatprep.subr.bf16.mxu0 %v3677_v14  ;;  %3718 = vmatprep.subr.bf16.mxu1 %v3717_v15  ;;  %v3697_v4 = vpack.c.bf16 %v3193_v0, %v3192_v63  ;;  %v884_v10 = vsel %vm881_vm9, %v882_v5, %v883_v6  ;;  %v886_v18 = vsel %vm881_vm9, %v883_v6, %v885_v9  ;;  %vm1099_vm6 = vcmask 125952  }
  0x64   :  { %3516 = vmatprep.mubr.msk.f32.mxu1 %vm1363_vm5, %v1398_v22  ;;  %vm1179_vm7 = vcmask 259203  }
  0x65   :  { %3439 = vmatmul.mubr.msk.f32.vlgmr.msra.gmra.mrb[0].mxu0 %vm129_vm2, %v550_v23  ;;  %3720 = vmatpush3.bf16.msra.mxu1 %v3717_v15  ;;  %v3200_v15 = vld [vmem:[%s5251_s3 + $0x110] sm:$0xff] }
  0x66   :  { %3680 = vmatpush3.bf16.msra.mxu0 %v3677_v14  ;;  %3441 = vmatprep.mubr.msk.f32.mxu0 %vm129_vm2, %v552_v28  ;;  %v887_v14 = vrot.slane %v4350_v26, 7  ;;  %v3705_v21 = vpack.c.bf16 %v3201_v17, %v3200_v15  ;;  %v3207_v28 = vld [vmem:[%s5256_s8] ss:$0 sm:$0xff]  ;;  %s4145_s8 = smov [#allocation10]  }
  0x67   :  { %3682 = vmatprep.subr.bf16.mxu0 %v3681_v25  ;;  %3722 = vmatprep.subr.bf16.mxu1 %v3721_v29 }
  0x68   :  { %v888_v20 = vsel %vm881_vm9, %v885_v9, %v887_v14  ;;  %v890_v22 = vsel %vm881_vm9, %v887_v14, %v889_v19  ;;  %vm1194_vm9 = vcmask 261254  }
  0x69   :  { %3442 = vmatmul.mubr.msk.f32.gmra.mrb[2].mxu0 %vm129_vm2, %v554_v34  ;;  %3724 = vmatpush3.bf16.msra.mxu1 %v3721_v29 }
  0x6a   :  { %3684 = vmatpush3.bf16.msra.mxu0 %v3681_v25  ;;  %3452 = vmatprep.mubr.msk.f32.mxu0 %vm129_vm2, %v660_v38 }
  0x6b   :  { %3686 = vmatprep.subr.bf16.mxu0 %v3685_v39  ;;  %3725 = vmatprep.subr.bf16.mxu1 %v4135_v49 }
  0x6c   :  { %3517 = vmatmul.mubr.msk.f32.vlgmr.msra.gmra.mrb[4].mxu1 %vm1363_vm5, %v1399_v43 }
  0x6d   :  { %3453 = vmatmul.mubr.msk.f32.vlgmr.msra.gmra.mrb[0].mxu0 %vm129_vm2, %v662_v45  ;;  %3727 = vmatpush3.bf16.msra.mxu1 %v4489_v44 }
  0x6e   :  { %3688 = vmatpush3.bf16.msra.mxu0 %v3685_v39  ;;  %3455 = vmatprep.mubr.msk.f32.mxu0 %vm129_vm2, %v664_v50 }
  0x6f   :  { %3690 = vmatprep.subr.bf16.mxu0 %v3689_v51  ;;  %3728 = vmatprep.subr.bf16.mxu1 %v4135_v49 }
  0x70   :  { %3527 = vmatprep.mubr.msk.f32.mxu1 %vm4136_vm8, %v4137_v62 }
  0x71   :  { %3456 = vmatmul.mubr.msk.f32.gmra.mrb[2].mxu0 %vm129_vm2, %v666_v57  ;;  %3730 = vmatpush3.bf16.msra.mxu1 %v4507_v56 }
  0x72   :  { %3692 = vmatpush3.bf16.msra.mxu0 %v3689_v51  ;;  %3466 = vmatprep.mubr.msk.f32.mxu0 %vm129_vm2, %v772_v59 }
  0x73   :  { %3694 = vmatprep.subr.bf16.mxu0 %v3693_v60  ;;  %3731 = vmatprep.subr.bf16.mxu1 %v4135_v49 }
  0x74   :  { %3528 = vmatmul.mubr.f32.vlgmr.msra.gmra.mrb[6].mxu1 %v4137_v62 }
  0x75   :  { %3467 = vmatmul.mubr.msk.f32.vlgmr.msra.gmra.mrb[0].mxu0 %vm129_vm2, %v774_v1  ;;  %3733 = vmatpush3.bf16.msra.mxu1 %v4489_v44 }
  0x76   :  { %3696 = vmatpush3.bf16.msra.mxu0 %v3693_v60  ;;  %3469 = vmatprep.mubr.msk.f32.mxu0 %vm129_vm2, %v776_v3 }
  0x77   :  { %3698 = vmatprep.subr.bf16.mxu0 %v3697_v4  ;;  %3734 = vmatprep.subr.bf16.mxu1 %v4135_v49 }
  0x78   :  { %3538 = vmatprep.mubr.msk.f32.mxu1 %vm4136_vm8, %v4137_v62 }
  0x79   :  { %3470 = vmatmul.mubr.msk.f32.gmra.mrb[2].mxu0 %vm129_vm2, %v778_v11  ;;  %3736 = vmatpush3.bf16.msra.mxu1 %v4507_v56 }
  0x7a   :  { %3700 = vmatpush3.bf16.msra.mxu0 %v3697_v4  ;;  %3480 = vmatprep.mubr.msk.f32.mxu0 %vm129_vm2, %v884_v10 }
  0x7b   :  { %3702 = vmatprep.subr.bf16.mxu0 %v3701_v12  ;;  %3737 = vmatprep.subr.bf16.mxu1 %v4135_v49 }
  0x7d   :  { %3481 = vmatmul.mubr.msk.f32.vlgmr.msra.gmra.mrb[0].mxu0 %vm129_vm2, %v886_v18 }
  0x7e   :  { %3704 = vmatpush3.bf16.msra.mxu0 %v3701_v12  ;;  %3483 = vmatprep.mubr.msk.f32.mxu0 %vm129_vm2, %v888_v20 }
  0x7f   :  { %3706 = vmatprep.subr.bf16.mxu0 %v3705_v21 }
  0x81   :  { %3484 = vmatmul.mubr.msk.f32.gmra.mrb[2].mxu0 %vm129_vm2, %v890_v22 }
  0x82   :  { %3708 = vmatpush3.bf16.msra.mxu0 %v3705_v21  ;;  %3494 = vmatprep.mubr.msk.f32.mxu0 %vm129_vm2, %v4322_v13 }
  0x83   :  { %3767 = vmatprep.subr.bf16.mxu0 %v4135_v49 }
  0x85   :  { %3495 = vmatmul.mubr.msk.f32.vlgmr.msra.gmra.mrb[0].mxu0 %vm129_vm2, %v4329_v16 }
  0x86   :  { %3497 = vmatprep.mubr.msk.f32.mxu0 %vm129_vm2, %v4350_v26  ;;  %3769 = vmatpush3.bf16.msra.mxu0 %v4489_v44 }
  0x87   :  { %3770 = vmatprep.subr.bf16.mxu0 %v4135_v49 }
  0x89   :  { %3498 = vmatmul.mubr.msk.f32.gmra.mrb[2].mxu0 %vm129_vm2, %v4355_v27 }
  0x8a   :  { %3772 = vmatpush3.bf16.msra.mxu0 %v4507_v56  ;;  %3604 = vmatprep.mubr.msk.f32.mxu0 %vm4136_vm8, %v4137_v62 }
  0x8b   :  { %3779 = vmatprep.subr.bf16.mxu0 %v4135_v49 }
 0x12f   :  { %v3398_v13 = vpop.f32.mrb[0].mxu1 }
 0x130   :  { %v297_v23 = vpop.f32.mrb[1].mxu1 }
 0x133   :  { %v3401_v16 = vpop.f32.mrb[2].mxu1 }
 0x134   :  { %v307_v24 = vpop.f32.mrb[3].mxu1 }
 0x13f   :  { %v3518_v25 = vpop.f32.mrb[4].mxu1 }
 0x140   :  { %v1487_v26 = vpop.f32.mrb[5].mxu1  ;;  %v4584_v30 = vadd.f32 %v3518_v25, %v3207_v28 }
 0x141   :  { %v4589_v33 = vadd.f32 %v3207_v28, %v1487_v26 }
 0x147   :  { %v1571_v29 = vpop.f32.mrb[6].mxu1 }
 0x148   :  { %v1576_v27 = vrot.slane %v1571_v29, 1  ;;  %v3529_v31 = vpop.f32.mrb[7].mxu1  ;;  %v4592_v34 = vadd.f32 %v1571_v29, %v4589_v33 }
 0x14a   :  { %v4587_v32 = vadd.f32 %v1576_v27, %v4584_v30 }
 0x14c   :  { %3881 = vtanh.f32 %v4587_v32 }
 0x14d   :  { %3883 = vtanh.f32 %v4592_v34 }
 0x156   :  { %v3882_v35 = vpop.eup %3881 }
 0x157   :  { %1601 = vrot.lane.b32.xlu0 %v3882_v35, %s4138_s16  ;;  %v3884_v41 = vpop.eup %3883 }
 0x158   :  { %v3496_v36 = vpop.f32.mrb[0].mxu0 }
 0x159   :  { %v3827_v38 = vadd.f32 %v3496_v36, %v3398_v13  ;;  %v1061_v39 = vpop.f32.mrb[1].mxu0 }
 0x15a   :  { %v3828_v40 = vadd.f32 %v1061_v39, %v297_v23 }
 0x15b   :  { %v1092_v42 = vadd.f32 %v3827_v38, %v3206_v37  ;;  %1599 = vrot.lane.b32.xlu0 %v3884_v41, %s4138_s16 }
 0x15c   :  { %v1091_v43 = vadd.f32 %v3828_v40, %v3206_v37  ;;  %v3499_v45 = vpop.f32.mrb[2].mxu0 }
 0x15d   :  { %v1096_v46 = vmax.f32 %v1092_v42, 0.0  ;;  %v3829_v47 = vadd.f32 %v3499_v45, %v3401_v16  ;;  %v1071_v48 = vpop.f32.mrb[3].mxu0 }
 0x15e   :  { %v4601_v50 = vmax.f32 %v1091_v43, 0.0  ;;  %v3830_v51 = vadd.f32 %v1071_v48, %v307_v24 }
 0x15f   :  { %v1132_v52 = vsel %vm1131_vm10, %v1096_v46, -inf  ;;  %v1150_v53 = vsel %vm1149_vm11, %v1096_v46, -inf  ;;  %v4606_v55 = vsel %vm1214_vm12, %v1096_v46, -inf  ;;  %v1094_v57 = vadd.f32 %v3829_v47, %v3206_v37 }
 0x160   :  { %v1151_v54 = vrot.slane %v1150_v53, 4  ;;  %v1093_v58 = vadd.f32 %v3830_v51, %v3206_v37  ;;  %v1130_v59 = vsel %vm1129_vm13, %v4601_v50, -inf  ;;  %v1115_v60 = vsel %vm1114_vm14, %v4601_v50, -inf }
 0x161   :  { %v1230_v61 = vsel %vm1229_vm15, %v4601_v50, -inf  ;;  %v1165_v63 = vsel %vm1164_vm0, %v4601_v50, -inf  ;;  %v4617_v0 = vsel %vm1196_vm1, %v1096_v46, -inf  ;;  %v1098_v1 = vmax.f32 %v1094_v57, 0.0 }
 0x162   :  { %v4619_v2 = vmax.f32 %v1093_v58, 0.0  ;;  %v1133_v3 = vmax.f32 %v1130_v59, %v1132_v52  ;;  %v1152_v4 = vmax.f32 %v1150_v53, %v1151_v54  ;;  %v1216_v5 = vrot.slane %v4606_v55, 4 }
 0x163   :  { %v1116_v6 = vrot.slane %v1115_v60, 4  ;;  %v1231_v7 = vrot.slane %v1230_v61, 4  ;;  %v1141_v8 = vsel %vm1131_vm10, %v1098_v1, -inf  ;;  %v1157_v11 = vsel %vm1149_vm11, %v1098_v1, -inf }
 0x164   :  { %v4625_v9 = vsel %vm1214_vm12, %v1098_v1, -inf  ;;  %v1166_v10 = vrot.slane %v1165_v63, 4  ;;  %v1158_v12 = vrot.slane %v1157_v11, 4  ;;  %v4628_v14 = vsel %vm1196_vm1, %v1098_v1, -inf }
 0x165   :  { %v1134_v15 = vrot.slane %v1133_v3, 4  ;;  %v1245_v17 = vsel %vm1244_vm3, %v4601_v50, -inf  ;;  %v1223_v18 = vrot.slane %v4625_v9, 4  ;;  %v1140_v19 = vsel %vm1129_vm13, %v4619_v2, -inf }
 0x166   :  { %v1117_v20 = vmax.f32 %v1115_v60, %v1116_v6  ;;  %v1122_v21 = vsel %vm1114_vm14, %v4619_v2, -inf  ;;  %v1159_v22 = vmax.f32 %v1157_v11, %v1158_v12  ;;  %v1142_v23 = vmax.f32 %v1140_v19, %v1141_v8 }
 0x167   :  { %v1135_v13 = vmax.f32 %v1133_v3, %v1134_v15  ;;  %v1123_v16 = vrot.slane %v1122_v21, 4  ;;  %v1232_v25 = vmax.f32 %v1230_v61, %v1231_v7  ;;  %v1237_v26 = vsel %vm1229_vm15, %v4619_v2, -inf }
 0x168   :  { %v1118_v24 = vrot.slane %v1117_v20, 2  ;;  %v1153_v28 = vrot.slane %v1152_v4, 2  ;;  %v1143_v27 = vrot.slane %v1142_v23, 4  ;;  %v1238_v35 = vrot.slane %v1237_v26, 4 }
 0x169   :  { %v1136_v29 = vrot.slane %v1135_v13, 2  ;;  %v1124_v31 = vmax.f32 %v1122_v21, %v1123_v16  ;;  %v1233_v37 = vrot.slane %v1232_v25, 2  ;;  %v1160_v39 = vrot.slane %v1159_v22, 2 }
 0x16a   :  { %v1119_v36 = vmax.f32 %v1117_v20, %v1118_v24  ;;  %v1154_v38 = vmax.f32 %v1152_v4, %v1153_v28  ;;  %v1144_v41 = vmax.f32 %v1142_v23, %v1143_v27  ;;  %v1239_v43 = vmax.f32 %v1237_v26, %v1238_v35 }
 0x16b   :  { %v1137_v40 = vmax.f32 %v1135_v13, %v1136_v29  ;;  %v1125_v42 = vrot.slane %v1124_v31, 2  ;;  %v1234_v46 = vmax.f32 %v1232_v25, %v1233_v37  ;;  %v1161_v48 = vmax.f32 %v1159_v22, %v1160_v39 }
 0x16c   :  { %v1120_v45 = vrot.slane %v1119_v36, 1  ;;  %v1155_v47 = vrot.slane %v1154_v38, 1  ;;  %v1145_v52 = vrot.slane %v1144_v41, 2  ;;  %v1240_v54 = vrot.slane %v1239_v43, 2 }
 0x16d   :  { %v1138_v51 = vrot.slane %v1137_v40, 1  ;;  %v1126_v53 = vmax.f32 %v1124_v31, %v1125_v42  ;;  %v1235_v58 = vrot.slane %v1234_v46, 1  ;;  %v1162_v60 = vrot.slane %v1161_v48, 1 }
 0x16e   :  { %v1121_v57 = vmax.f32 %v1119_v36, %v1120_v45  ;;  %v1156_v59 = vmax.f32 %v1154_v38, %v1155_v47  ;;  %v1146_v1 = vmax.f32 %v1144_v41, %v1145_v52  ;;  %v1241_v4 = vmax.f32 %v1239_v43, %v1240_v54 }
 0x16f   :  { %v1139_v61 = vmax.f32 %v1137_v40, %v1138_v51  ;;  %v1127_v3 = vrot.slane %v1126_v53, 1  ;;  %v1236_v6 = vmax.f32 %v1234_v46, %v1235_v58  ;;  %v1163_v7 = vmax.f32 %v1161_v48, %v1162_v60 }
 0x170   :  { %v1167_v8 = vmax.f32 %v1165_v63, %v1166_v10  ;;  %v1172_v11 = vsel %vm1164_vm0, %v4619_v2, -inf  ;;  %v1147_v12 = vrot.slane %v1146_v1, 1  ;;  %v1242_v19 = vrot.slane %v1241_v4, 1 }
 0x171   :  { %v1128_v15 = vmax.f32 %v1126_v53, %v1127_v3  ;;  %v1173_v20 = vrot.slane %v1172_v11, 4  ;;  %v4642_v22 = vsel %vm1291_vm4, %v1163_v7, %v1156_v59  ;;  %v1246_v13 = vrot.slane %v1245_v17, 4 }
 0x172   :  { %v1168_v21 = vrot.slane %v1167_v8, 2  ;;  %v1252_v23 = vsel %vm1244_vm3, %v4619_v2, -inf  ;;  %v1148_v16 = vmax.f32 %v1146_v1, %v1147_v12  ;;  %v1243_v63 = vmax.f32 %v1241_v4, %v1242_v19 }
 0x173   :  { %v4647_v24 = vsel %vm1291_vm4, %v1128_v15, %v1121_v57  ;;  %v1174_v10 = vmax.f32 %v1172_v11, %v1173_v20  ;;  %v1247_v26 = vmax.f32 %v1245_v17, %v1246_v13  ;;  %v1253_v28 = vrot.slane %v1252_v23, 4 }
 0x174   :  { %v1169_v25 = vmax.f32 %v1167_v8, %v1168_v21  ;;  %v1100_v29 = vsel %vm1099_vm6, %v4601_v50, -inf  ;;  %v4652_v27 = vsel %vm1291_vm4, %v1148_v16, %v1139_v61  ;;  %v4655_v31 = vsel %vm1291_vm4, %v1243_v63, %v1236_v6 }
 0x175   :  { %v1175_v35 = vrot.slane %v1174_v10, 2  ;;  %v1101_v36 = vrot.slane %v1100_v29, 4  ;;  %v1248_v38 = vrot.slane %v1247_v26, 2  ;;  %v1254_v39 = vmax.f32 %v1252_v23, %v1253_v28 }
 0x176   :  { %v1170_v37 = vrot.slane %v1169_v25, 1  ;;  %v1107_v40 = vsel %vm1099_vm6, %v4619_v2, -inf  ;;  %vm1274_vm10 = vcmask 392454   ;;  %v1180_v43 = vsel %vm1179_vm7, %v4601_v50, -inf }
 0x177   :  { %v1176_v17 = vmax.f32 %v1174_v10, %v1175_v35  ;;  %v1102_v41 = vmax.f32 %v1100_v29, %v1101_v36  ;;  %v1108_v42 = vrot.slane %v1107_v40, 4  ;;  %v1249_v46 = vmax.f32 %v1247_v26, %v1248_v38 }
 0x178   :  { %v1171_v45 = vmax.f32 %v1169_v25, %v1170_v37  ;;  %v1255_v47 = vrot.slane %v1254_v39, 2  ;;  %v1181_v48 = vrot.slane %v1180_v43, 4  ;;  %v1187_v54 = vsel %vm1179_vm7, %v4619_v2, -inf }
 0x179   :  { %v1177_v51 = vrot.slane %v1176_v17, 1  ;;  %v1103_v52 = vrot.slane %v1102_v41, 2  ;;  %v1109_v53 = vmax.f32 %v1107_v40, %v1108_v42  ;;  %v1250_v57 = vrot.slane %v1249_v46, 1 }
 0x17a   :  { %v1256_v58 = vmax.f32 %v1254_v39, %v1255_v47  ;;  %v1182_v59 = vmax.f32 %v1180_v43, %v1181_v48  ;;  %v1188_v60 = vrot.slane %v1187_v54, 4  ;;  %vm1259_vm11 = vcmask 390404  }
 0x17b   :  { %v1178_v61 = vmax.f32 %v1176_v17, %v1177_v51  ;;  %v1104_v1 = vmax.f32 %v1102_v41, %v1103_v52  ;;  %v1110_v3 = vrot.slane %v1109_v53, 2  ;;  %v1195_v4 = vsel %vm1194_vm9, %v4601_v50, -inf }
 0x17c   :  { %v1251_v6 = vmax.f32 %v1249_v46, %v1250_v57  ;;  %v1257_v7 = vrot.slane %v1256_v58, 1  ;;  %v1183_v8 = vrot.slane %v1182_v59, 2  ;;  %v1189_v11 = vmax.f32 %v1187_v54, %v1188_v60 }
 0x17d   :  { %v4666_v12 = vsel %vm1291_vm4, %v1178_v61, %v1171_v45  ;;  %v1105_v15 = vrot.slane %v1104_v1, 1  ;;  %v1111_v19 = vmax.f32 %v1109_v53, %v1110_v3  ;;  %v1198_v20 = vmax.f32 %v1195_v4, %v4617_v0 }
 0x17e   :  { %v3876_v21 = vpack.i.bf16 %v4666_v12, %v4642_v22  ;;  %v1258_v13 = vmax.f32 %v1256_v58, %v1257_v7  ;;  %v1184_v23 = vmax.f32 %v1182_v59, %v1183_v8  ;;  %v1190_v16 = vrot.slane %v1189_v11, 2  ;;  %v1385_v12 = vld [vmem:[%s5253_s5 + $0x58] sm:$0xff] }
 0x17f   :  { %v1106_v63 = vmax.f32 %v1104_v1, %v1105_v15  ;;  %v1112_v10 = vrot.slane %v1111_v19, 1  ;;  %v1199_v25 = vrot.slane %v1198_v20, 4  ;;  %v1205_v26 = vsel %vm1194_vm9, %v4619_v2, -inf }
 0x180   :  { %v4674_v28 = vsel %vm1291_vm4, %v1258_v13, %v1251_v6  ;;  %v1185_v29 = vrot.slane %v1184_v23, 1  ;;  %v1191_v35 = vmax.f32 %v1189_v11, %v1190_v16  ;;  %v1207_v36 = vmax.f32 %v1205_v26, %v4628_v14 }
 0x181   :  { %v1113_v0 = vmax.f32 %v1111_v19, %v1112_v10  ;;  %v1200_v37 = vmax.f32 %v1198_v20, %v1199_v25  ;;  %v1275_v38 = vsel %vm1274_vm10, %v4601_v50, -inf  ;;  %v1282_v39 = vsel %vm1274_vm10, %v4619_v2, -inf }
 0x182   :  { %v1186_v40 = vmax.f32 %v1184_v23, %v1185_v29  ;;  %v1192_v17 = vrot.slane %v1191_v35, 1  ;;  %v1208_v41 = vrot.slane %v1207_v36, 4  ;;  %v1276_v42 = vrot.slane %v1275_v38, 4 }
 0x183   :  { %v4682_v43 = vsel %vm1291_vm4, %v1113_v0, %v1106_v63  ;;  %v1201_v45 = vrot.slane %v1200_v37, 2  ;;  %v1283_v46 = vrot.slane %v1282_v39, 4  ;;  %v1217_v14 = vmax.f32 %v4606_v55, %v1216_v5 }
 0x184   :  { %v1193_v47 = vmax.f32 %v1191_v35, %v1192_v17  ;;  %v1209_v48 = vmax.f32 %v1207_v36, %v1208_v41  ;;  %v1277_v51 = vmax.f32 %v1275_v38, %v1276_v42  ;;  %v1224_v52 = vmax.f32 %v4625_v9, %v1223_v18 }
 0x185   :  { %v1202_v53 = vmax.f32 %v1200_v37, %v1201_v45  ;;  %v1284_v54 = vmax.f32 %v1282_v39, %v1283_v46  ;;  %v1218_v57 = vrot.slane %v1217_v14, 2  ;;  %v1260_v58 = vsel %vm1259_vm11, %v4601_v50, -inf }
 0x186   :  { %v4693_v59 = vsel %vm1291_vm4, %v1193_v47, %v1186_v40  ;;  %v1210_v60 = vrot.slane %v1209_v48, 2  ;;  %v1278_v61 = vrot.slane %v1277_v51, 2  ;;  %v1225_v1 = vrot.slane %v1224_v52, 2 }
 0x187   :  { %v1203_v55 = vrot.slane %v1202_v53, 1  ;;  %v1285_v5 = vrot.slane %v1284_v54, 2  ;;  %v1219_v3 = vmax.f32 %v1217_v14, %v1218_v57  ;;  %v1261_v4 = vrot.slane %v1260_v58, 4 }
 0x188   :  { %v1211_v6 = vmax.f32 %v1209_v48, %v1210_v60  ;;  %v1279_v7 = vmax.f32 %v1277_v51, %v1278_v61  ;;  %v1226_v8 = vmax.f32 %v1224_v52, %v1225_v1  ;;  %v1267_v9 = vsel %vm1259_vm11, %v4619_v2, -inf }
 0x189   :  { %v1286_v18 = vmax.f32 %v1284_v54, %v1285_v5  ;;  %v1220_v11 = vrot.slane %v1219_v3, 1  ;;  %v1262_v15 = vmax.f32 %v1260_v58, %v1261_v4  ;;  %v1268_v13 = vrot.slane %v1267_v9, 4 }
 0x18a   :  { %v1212_v50 = vrot.slane %v1211_v6, 1  ;;  %v1280_v19 = vrot.slane %v1279_v7, 1  ;;  %v1227_v20 = vrot.slane %v1226_v8, 1  ;;  %v1204_v23 = vmax.f32 %v1202_v53, %v1203_v55 }
 0x18b   :  { %v1287_v16 = vrot.slane %v1286_v18, 1  ;;  %v1263_v63 = vrot.slane %v1262_v15, 2  ;;  %v1221_v25 = vmax.f32 %v1219_v3, %v1220_v11  ;;  %v1269_v29 = vmax.f32 %v1267_v9, %v1268_v13 }
 0x18c   :  { %v1213_v10 = vmax.f32 %v1211_v6, %v1212_v50  ;;  %v1228_v26 = vmax.f32 %v1226_v8, %v1227_v20  ;;  %v1281_v35 = vmax.f32 %v1279_v7, %v1280_v19  ;;  %v3211_v14 = vmul.f32 -1.442695, %v4587_v32  ;;  %v4724_v19 = vld [vmem:[#allocation5] sm:$0xff] }
 0x18d   :  { %v1288_v36 = vmax.f32 %v1286_v18, %v1287_v16  ;;  %v1264_v0 = vmax.f32 %v1262_v15, %v1263_v63  ;;  %v1270_v38 = vrot.slane %v1269_v29, 2  ;;  %v3210_v47 = vmul.f32 -1.442695, %v4592_v34  ;;  %v4719_v15 = vld [vmem:[#allocation5 + $0x8] sm:$0xff] }
 0x18e   :  { %v4698_v37 = vsel %vm1291_vm4, %v1213_v10, %v1204_v23  ;;  %v4701_v2 = vsel %vm1291_vm4, %v1228_v26, %v1221_v25  ;;  %3885 = vpow2.f32 %v3211_v14  ;;  %v4722_v50 = vsub.f32 1.0, %v4719_v15 }
 0x18f   :  { %v4704_v39 = vsel %vm1291_vm4, %v1288_v36, %v1281_v35  ;;  %v1265_v40 = vrot.slane %v1264_v0, 1  ;;  %v1271_v17 = vmax.f32 %v1269_v29, %v1270_v38  ;;  %3887 = vpow2.f32 %v3210_v47 }
 0x190   :  { %v1642_v20 = vmul.f32 0.0, %v4722_v50  ;;  %v4728_v13 = vsub.f32 1.0, %v4724_v19  ;;  %vm1358_vm12 = vcmask 130048   ;;  %vm1361_vm13 = vcmask 392192  }
 0x191   :  { %v1272_v41 = vrot.slane %v1271_v17, 1  ;;  %v1266_v42 = vmax.f32 %v1264_v0, %v1265_v40  ;;  %vm1365_vm14 = vcmask 654336   ;;  %vm1367_vm15 = vcmask 785408  }
 0x192   :  { %v1641_v10 = vmul.f32 0.0, %v4728_v13  ;;  %vm1369_vm0 = vcmask 916480  }
 0x193   :  { %v1273_v45 = vmax.f32 %v1271_v17, %v1272_v41 }
 0x195   :  { %v4707_v46 = vsel %vm1291_vm4, %v1273_v45, %v1266_v42 }
 0x198   :  { %v3886_v48 = vpop.eup %3885 }
 0x199   :  { %v1588_v51 = vadd.f32 1.0, %v3886_v48  ;;  %v3888_v52 = vpop.eup %3887 }
 0x19a   :  { %v1587_v53 = vadd.f32 1.0, %v3888_v52 }
 0x19b   :  { %3889 = vrcp.f32 %v1588_v51 }
 0x19c   :  { %3891 = vrcp.f32 %v1587_v53 }
 0x1a5   :  { %v3890_v54 = vpop.eup %3889 }
 0x1a6   :  { %v3892_v60 = vpop.eup %3891  ;;  %v1596_v32 = vmul.f32 0.0, %v3890_v54 }
 0x1a7   :  { %v1595_v5 = vmul.f32 0.0, %v3892_v60 }
 0x1c9   :  { %v1602_v57 = vpop.permute.xlu0 %1601 }
 0x1ca   :  { %v1606_v58 = vmul.f32 %v3890_v54, %v1602_v57 }
 0x1cc   :  { %1611 = vrot.lane.b32.xlu1 %v1606_v58, %s4138_s16 }
 0x1cd   :  { %v1600_v61 = vpop.permute.xlu0 %1599 }
 0x1ce   :  { %v1605_v1 = vmul.f32 %v3892_v60, %v1600_v61 }
 0x1d0   :  { %1609 = vrot.lane.b32.xlu1 %v1605_v1, %s4138_s16 }
 0x23e   :  { %v1612_v34 = vpop.permute.xlu1 %1611 }
 0x23f   :  { %v1616_v55 = vadd.f32 %v1612_v34, %v1596_v32 }
 0x241   :  { %3893 = vtanh.f32 %v1616_v55 }
 0x242   :  { %v1610_v3 = vpop.permute.xlu1 %1609 }
 0x243   :  { %v1615_v4 = vadd.f32 %v1610_v3, %v1595_v5 }
 0x245   :  { %3895 = vtanh.f32 %v1615_v4 }
 0x24b   :  { %v3894_v6 = vpop.eup %3893 }
 0x24c   :  { %1623 = vrot.lane.b32.xlu0 %v3894_v6, %s4138_s16 }
 0x24f   :  { %v3896_v7 = vpop.eup %3895 }
 0x250   :  { %1621 = vrot.lane.b32.xlu1 %v3896_v7, %s4138_s16 }
 0x2be   :  { %v1624_v8 = vpop.permute.xlu0 %1623 }
 0x2bf   :  { %v1628_v9 = vmul.f32 %v3890_v54, %v1624_v8 }
 0x2c1   :  { %1633 = vrot.lane.b32.xlu0 %v1628_v9, %s4139_s4 }
 0x2c2   :  { %v1622_v18 = vpop.permute.xlu1 %1621 }
 0x2c3   :  { %v1627_v11 = vmul.f32 %v3892_v60, %v1622_v18 }
 0x2c5   :  { %1647 = vrot.lane.b32.xlu0 %v1615_v4, %s4140_s2  ;;  %1631 = vrot.lane.b32.xlu1 %v1627_v11, %s4139_s4 }
 0x2c9   :  { %1649 = vrot.lane.b32.xlu1 %v1616_v55, %s4140_s2 }
 0x333   :  { %v1634_v23 = vpop.permute.xlu0 %1633 }
 0x334   :  { %v1638_v16 = vmul.f32 %v1634_v23, %v4719_v15 }
 0x336   :  { %v4731_v63 = vadd.f32 %v1642_v20, %v1638_v16 }
 0x337   :  { %v1632_v25 = vpop.permute.xlu1 %1631  ;;  %v1648_v45 = vpop.permute.xlu0 %1647 }
 0x338   :  { %v1637_v26 = vmul.f32 %v1632_v25, %v4724_v19  ;;  %v1659_v29 = vrot.slane %v4731_v63, 7  ;;  %v1653_v47 = vmul.f32 %v1648_v45, %v4724_v19 }
 0x33a   :  { %v4736_v35 = vadd.f32 %v1641_v10, %v1637_v26  ;;  %v4756_v52 = vadd.f32 %v1653_v47, %v1641_v10 }
 0x33b   :  { %v1650_v42 = vpop.permute.xlu1 %1649 }
 0x33c   :  { %v1660_v36 = vsel %vm1291_vm4, %v1659_v29, %v4736_v35  ;;  %v1654_v14 = vmul.f32 %v1650_v42, %v4719_v15  ;;  %v1755_v57 = vrot.slane %v4756_v52, 7 }
 0x33d   :  { %3539 = vmatmul.mubr.msk.f32.vlgmr.msra.gmra.mrb[8].mxu1 %vm129_vm2, %v1660_v36 }
 0x33e   :  { %3739 = vmatpush3.bf16.msra.mxu1 %v4489_v44  ;;  %3549 = vmatprep.mubr.msk.f32.mxu1 %vm4136_vm8, %v4137_v62  ;;  %v4753_v48 = vadd.f32 %v1654_v14, %v1642_v20 }
 0x33f   :  { %3740 = vmatprep.subr.bf16.mxu1 %v4135_v49 }
 0x340   :  { %v1756_v54 = vrot.slane %v4753_v48, 7 }
 0x342   :  { %3742 = vmatpush3.bf16.msra.mxu1 %v4507_v56 }
 0x343   :  { %3743 = vmatprep.subr.bf16.mxu1 %v4135_v49 }
 0x410   :  { %v1729_v0 = vpop.f32.mrb[8].mxu1 }
 0x411   :  { %v1734_v38 = vrot.slane %v1729_v0, 7  ;;  %v1738_v40 = vadd.f32 %v1729_v0, %v4584_v30  ;;  %v3540_v17 = vpop.f32.mrb[9].mxu1 }
 0x412   :  { %v1807_v17 = vrot.slane %v4736_v35, 7 }
 0x413   :  { %v1737_v41 = vadd.f32 %v1734_v38, %v4589_v33  ;;  %3897 = vtanh.f32 %v1738_v40  ;;  %v3214_v58 = vmul.f32 -1.442695, %v1738_v40 }
 0x414   :  { %v1810_v14 = vmul.f32 %v1807_v17, %v4728_v13 }
 0x415   :  { %3899 = vtanh.f32 %v1737_v41  ;;  %v3213_v60 = vmul.f32 -1.442695, %v1737_v41 }
 0x416   :  { %3901 = vpow2.f32 %v3214_v58 }
 0x417   :  { %3903 = vpow2.f32 %v3213_v60 }
 0x41d   :  { %v3898_v51 = vpop.eup %3897 }
 0x41e   :  { %1769 = vrot.lane.b32.xlu1 %v3898_v51, %s4138_s16  ;;  %v1811_v51 = vmul.f32 %v1659_v29, %v4722_v50 }
 0x41f   :  { %v3900_v53 = vpop.eup %3899 }
 0x420   :  { %1767 = vrot.lane.b32.xlu0 %v3900_v53, %s4138_s16  ;;  %v3902_v61 = vpop.eup %3901 }
 0x421   :  { %v3904_v1 = vpop.eup %3903  ;;  %v1746_v32 = vadd.f32 1.0, %v3902_v61 }
 0x422   :  { %1759 = vrot.lane.b32.xlu1 %v1756_v54, %s4138_s16  ;;  %v1745_v34 = vadd.f32 1.0, %v3904_v1 }
 0x423   :  { %3905 = vrcp.f32 %v1746_v32 }
 0x424   :  { %1757 = vrot.lane.b32.xlu0 %v1755_v57, %s4138_s16  ;;  %3907 = vrcp.f32 %v1745_v34 }
 0x42d   :  { %v3906_v55 = vpop.eup %3905 }
 0x42e   :  { %v3908_v4 = vpop.eup %3907 }
 0x490   :  { %v1770_v5 = vpop.permute.xlu1 %1769 }
 0x491   :  { %v1774_v3 = vmul.f32 %v3906_v55, %v1770_v5 }
 0x492   :  { %v1768_v6 = vpop.permute.xlu0 %1767 }
 0x493   :  { %1779 = vrot.lane.b32.xlu1 %v1774_v3, %s4138_s16  ;;  %v1773_v7 = vmul.f32 %v3908_v4, %v1768_v6  ;;  %v1826_v6 = vmul.f32 %v1755_v57, %v4728_v13 }
 0x494   :  { %v1760_v8 = vpop.permute.xlu1 %1759 }
 0x495   :  { %1777 = vrot.lane.b32.xlu0 %v1773_v7, %s4138_s16  ;;  %v1764_v9 = vmul.f32 %v3906_v55, %v1760_v8  ;;  %v1827_v7 = vmul.f32 %v1756_v54, %v4722_v50 }
 0x496   :  { %v1758_v18 = vpop.permute.xlu0 %1757 }
 0x497   :  { %v1763_v23 = vmul.f32 %v3908_v4, %v1758_v18 }
 0x505   :  { %v1780_v11 = vpop.permute.xlu1 %1779 }
 0x506   :  { %v1784_v20 = vadd.f32 %v1780_v11, %v1764_v9 }
 0x507   :  { %v1778_v16 = vpop.permute.xlu0 %1777 }
 0x508   :  { %3909 = vtanh.f32 %v1784_v20  ;;  %v1783_v10 = vadd.f32 %v1778_v16, %v1763_v23 }
 0x50a   :  { %3911 = vtanh.f32 %v1783_v10 }
 0x512   :  { %v3910_v25 = vpop.eup %3909 }
 0x513   :  { %1791 = vrot.lane.b32.xlu1 %v3910_v25, %s4138_s16 }
 0x514   :  { %v3912_v26 = vpop.eup %3911 }
 0x515   :  { %1789 = vrot.lane.b32.xlu0 %v3912_v26, %s4138_s16 }
 0x585   :  { %v1792_v36 = vpop.permute.xlu1 %1791 }
 0x586   :  { %v1796_v0 = vmul.f32 %v3906_v55, %v1792_v36 }
 0x587   :  { %v1790_v38 = vpop.permute.xlu0 %1789 }
 0x588   :  { %1801 = vrot.lane.b32.xlu1 %v1796_v0, %s4139_s4  ;;  %v1795_v40 = vmul.f32 %v3908_v4, %v1790_v38 }
 0x58a   :  { %1799 = vrot.lane.b32.xlu0 %v1795_v40, %s4139_s4 }
 0x58c   :  { %1818 = vrot.lane.b32.xlu1 %v1784_v20, %s4140_s2 }
 0x58e   :  { %1816 = vrot.lane.b32.xlu0 %v1783_v10, %s4140_s2 }
 0x5fa   :  { %v1802_v41 = vpop.permute.xlu1 %1801 }
 0x5fb   :  { %v1806_v45 = vmul.f32 %v1802_v41, %v4719_v15 }
 0x5fc   :  { %v1800_v42 = vpop.permute.xlu0 %1799 }
 0x5fd   :  { %v1805_v47 = vmul.f32 %v1800_v42, %v4724_v19  ;;  %v4784_v58 = vadd.f32 %v1811_v51, %v1806_v45 }
 0x5fe   :  { %v1819_v5 = vpop.permute.xlu1 %1818 }
 0x5ff   :  { %v4782_v53 = vadd.f32 %v1810_v14, %v1805_v47  ;;  %v1823_v4 = vmul.f32 %v1819_v5, %v4719_v15 }
 0x600   :  { %v1817_v55 = vpop.permute.xlu0 %1816 }
 0x601   :  { %v1832_v60 = vrot.slane %v4782_v53, 1  ;;  %v1822_v3 = vmul.f32 %v1817_v55, %v4724_v19  ;;  %v4808_v18 = vadd.f32 %v1827_v7, %v1823_v4  ;;  %v1982_v55 = vrot.slane %v4784_v58, 7 }
 0x603   :  { %v1833_v35 = vsel %vm1291_vm4, %v4784_v58, %v1832_v60  ;;  %v4806_v8 = vadd.f32 %v1826_v6, %v1822_v3  ;;  %v1930_v23 = vrot.slane %v4808_v18, 7  ;;  %v1986_v7 = vmul.f32 %v1982_v55, %v4722_v50 }
 0x604   :  { %3550 = vmatmul.mubr.msk.f32.vlgmr.msra.gmra.mrb[10].mxu1 %vm129_vm2, %v1833_v35 }
 0x605   :  { %3745 = vmatpush3.bf16.msra.mxu1 %v4489_v44  ;;  %3560 = vmatprep.mubr.msk.f32.mxu1 %vm4136_vm8, %v4137_v62  ;;  %v1929_v20 = vrot.slane %v4806_v8, 7 }
 0x606   :  { %3746 = vmatprep.subr.bf16.mxu1 %v4135_v49 }
 0x609   :  { %3748 = vmatpush3.bf16.msra.mxu1 %v4507_v56 }
 0x60a   :  { %3749 = vmatprep.subr.bf16.mxu1 %v4135_v49 }
 0x6d7   :  { %v1902_v63 = vpop.f32.mrb[10].mxu1 }
 0x6d8   :  { %v1907_v29 = vrot.slane %v1902_v63, 6  ;;  %v1908_v61 = vrot.slane %v1902_v63, 7  ;;  %v3551_v1 = vpop.f32.mrb[11].mxu1 }
 0x6da   :  { %v1911_v32 = vadd.f32 %v1907_v29, %v4589_v33  ;;  %v1912_v34 = vadd.f32 %v1908_v61, %v4584_v30 }
 0x6dc   :  { %3913 = vtanh.f32 %v1911_v32  ;;  %v3216_v48 = vmul.f32 -1.442695, %v1911_v32  ;;  %v3217_v52 = vmul.f32 -1.442695, %v1912_v34 }
 0x6dd   :  { %3915 = vtanh.f32 %v1912_v34  ;;  %v1981_v34 = vrot.slane %v4782_v53, 7 }
 0x6de   :  { %3917 = vpow2.f32 %v3216_v48 }
 0x6df   :  { %3919 = vpow2.f32 %v3217_v52  ;;  %v1985_v3 = vmul.f32 %v1981_v34, %v4728_v13 }
 0x6e6   :  { %v3914_v9 = vpop.eup %3913 }
 0x6e7   :  { %v3916_v11 = vpop.eup %3915  ;;  %1941 = vrot.lane.b32.xlu0 %v3914_v9, %s4138_s16 }
 0x6e8   :  { %1943 = vrot.lane.b32.xlu1 %v3916_v11, %s4138_s16  ;;  %v3918_v54 = vpop.eup %3917 }
 0x6e9   :  { %v3920_v57 = vpop.eup %3919  ;;  %v1919_v16 = vadd.f32 1.0, %v3918_v54 }
 0x6ea   :  { %v1920_v10 = vadd.f32 1.0, %v3920_v57 }
 0x6eb   :  { %1931 = vrot.lane.b32.xlu0 %v1929_v20, %s4138_s16  ;;  %3921 = vrcp.f32 %v1919_v16 }
 0x6ec   :  { %1933 = vrot.lane.b32.xlu1 %v1930_v23, %s4138_s16  ;;  %3923 = vrcp.f32 %v1920_v10 }
 0x6f5   :  { %v3922_v25 = vpop.eup %3921 }
 0x6f6   :  { %v3924_v36 = vpop.eup %3923 }
 0x759   :  { %v1942_v26 = vpop.permute.xlu0 %1941 }
 0x75a   :  { %v1947_v0 = vmul.f32 %v3922_v25, %v1942_v26  ;;  %v1944_v38 = vpop.permute.xlu1 %1943 }
 0x75b   :  { %v1948_v40 = vmul.f32 %v3924_v36, %v1944_v38 }
 0x75c   :  { %1951 = vrot.lane.b32.xlu0 %v1947_v0, %s4138_s16 }
 0x75d   :  { %1953 = vrot.lane.b32.xlu1 %v1948_v40, %s4138_s16  ;;  %v1932_v17 = vpop.permute.xlu0 %1931 }
 0x75e   :  { %v1934_v41 = vpop.permute.xlu1 %1933  ;;  %v1937_v42 = vmul.f32 %v3922_v25, %v1932_v17  ;;  %v2001_v17 = vmul.f32 %v1929_v20, %v4728_v13 }
 0x75f   :  { %v1938_v45 = vmul.f32 %v3924_v36, %v1934_v41  ;;  %v2002_v41 = vmul.f32 %v1930_v23, %v4722_v50 }
 0x7ce   :  { %v1952_v14 = vpop.permute.xlu0 %1951 }
 0x7cf   :  { %v1957_v47 = vadd.f32 %v1952_v14, %v1937_v42  ;;  %v1954_v51 = vpop.permute.xlu1 %1953 }
 0x7d0   :  { %v1958_v60 = vadd.f32 %v1954_v51, %v1938_v45 }
 0x7d1   :  { %3925 = vtanh.f32 %v1957_v47 }
 0x7d2   :  { %3927 = vtanh.f32 %v1958_v60 }
 0x7db   :  { %v3926_v35 = vpop.eup %3925 }
 0x7dc   :  { %v3928_v63 = vpop.eup %3927  ;;  %1963 = vrot.lane.b32.xlu0 %v3926_v35, %s4138_s16 }
 0x7dd   :  { %1965 = vrot.lane.b32.xlu1 %v3928_v63, %s4138_s16 }
 0x84e   :  { %v1964_v29 = vpop.permute.xlu0 %1963 }
 0x84f   :  { %v1969_v61 = vmul.f32 %v3922_v25, %v1964_v29  ;;  %v1966_v1 = vpop.permute.xlu1 %1965 }
 0x850   :  { %v1970_v32 = vmul.f32 %v3924_v36, %v1966_v1 }
 0x851   :  { %1973 = vrot.lane.b32.xlu0 %v1969_v61, %s4139_s4 }
 0x852   :  { %1975 = vrot.lane.b32.xlu1 %v1970_v32, %s4139_s4 }
 0x855   :  { %1991 = vrot.lane.b32.xlu0 %v1957_v47, %s4140_s2 }
 0x856   :  { %1993 = vrot.lane.b32.xlu1 %v1958_v60, %s4140_s2 }
 0x8c3   :  { %v1974_v5 = vpop.permute.xlu0 %1973 }
 0x8c4   :  { %v1979_v4 = vmul.f32 %v1974_v5, %v4724_v19  ;;  %v1976_v6 = vpop.permute.xlu1 %1975 }
 0x8c5   :  { %v1980_v9 = vmul.f32 %v1976_v6, %v4719_v15 }
 0x8c6   :  { %v4834_v11 = vadd.f32 %v1985_v3, %v1979_v4 }
 0x8c7   :  { %v4836_v48 = vadd.f32 %v1986_v7, %v1980_v9  ;;  %v1992_v36 = vpop.permute.xlu0 %1991 }
 0x8c8   :  { %v2007_v52 = vrot.slane %v4834_v11, 2  ;;  %v1994_v0 = vpop.permute.xlu1 %1993  ;;  %v1997_v38 = vmul.f32 %v1992_v36, %v4724_v19 }
 0x8c9   :  { %v2008_v53 = vrot.slane %v4836_v48, 1  ;;  %v1998_v40 = vmul.f32 %v1994_v0, %v4719_v15  ;;  %v2158_v36 = vrot.slane %v4836_v48, 7 }
 0x8ca   :  { %v4858_v42 = vadd.f32 %v2001_v17, %v1997_v38 }
 0x8cb   :  { %v2009_v58 = vsel %vm1291_vm4, %v2008_v53, %v2007_v52  ;;  %v4860_v14 = vadd.f32 %v2002_v41, %v1998_v40  ;;  %v2162_v41 = vmul.f32 %v2158_v36, %v4722_v50 }
 0x8cc   :  { %3561 = vmatmul.mubr.msk.f32.vlgmr.msra.gmra.mrb[12].mxu1 %vm129_vm2, %v2009_v58  ;;  %v2105_v51 = vrot.slane %v4858_v42, 7 }
 0x8cd   :  { %3751 = vmatpush3.bf16.msra.mxu1 %v4489_v44  ;;  %3571 = vmatprep.mubr.msk.f32.mxu1 %vm4136_vm8, %v4137_v62  ;;  %v2106_v60 = vrot.slane %v4860_v14, 7 }
 0x8ce   :  { %3752 = vmatprep.subr.bf16.mxu1 %v4135_v49 }
 0x8d1   :  { %3754 = vmatpush3.bf16.msra.mxu1 %v4507_v56 }
 0x8d2   :  { %3755 = vmatprep.subr.bf16.mxu1 %v4135_v49 }
 0x99f   :  { %v2078_v54 = vpop.f32.mrb[12].mxu1 }
 0x9a0   :  { %v2083_v57 = vrot.slane %v2078_v54, 5  ;;  %v2084_v16 = vrot.slane %v2078_v54, 6  ;;  %v3562_v10 = vpop.f32.mrb[13].mxu1 }
 0x9a2   :  { %v2087_v25 = vadd.f32 %v2083_v57, %v4589_v33  ;;  %v2088_v26 = vadd.f32 %v2084_v16, %v4584_v30 }
 0x9a4   :  { %3929 = vtanh.f32 %v2087_v25  ;;  %v3219_v8 = vmul.f32 -1.442695, %v2087_v25  ;;  %v3220_v18 = vmul.f32 -1.442695, %v2088_v26 }
 0x9a5   :  { %3931 = vtanh.f32 %v2088_v26  ;;  %v2157_v26 = vrot.slane %v4834_v11, 7 }
 0x9a6   :  { %3933 = vpow2.f32 %v3219_v8 }
 0x9a7   :  { %3935 = vpow2.f32 %v3220_v18  ;;  %v2161_v38 = vmul.f32 %v2157_v26, %v4728_v13 }
 0x9ae   :  { %v3930_v45 = vpop.eup %3929 }
 0x9af   :  { %v3932_v47 = vpop.eup %3931  ;;  %2117 = vrot.lane.b32.xlu0 %v3930_v45, %s4138_s16 }
 0x9b0   :  { %2119 = vrot.lane.b32.xlu1 %v3932_v47, %s4138_s16  ;;  %v3934_v20 = vpop.eup %3933 }
 0x9b1   :  { %v3936_v23 = vpop.eup %3935  ;;  %v2095_v35 = vadd.f32 1.0, %v3934_v20 }
 0x9b2   :  { %v2096_v63 = vadd.f32 1.0, %v3936_v23 }
 0x9b3   :  { %2107 = vrot.lane.b32.xlu0 %v2105_v51, %s4138_s16  ;;  %3937 = vrcp.f32 %v2095_v35 }
 0x9b4   :  { %2109 = vrot.lane.b32.xlu1 %v2106_v60, %s4138_s16  ;;  %3939 = vrcp.f32 %v2096_v63 }
 0x9bd   :  { %v3938_v29 = vpop.eup %3937 }
 0x9be   :  { %v3940_v1 = vpop.eup %3939 }
 0xa21   :  { %v2118_v61 = vpop.permute.xlu0 %2117 }
 0xa22   :  { %v2123_v32 = vmul.f32 %v3938_v29, %v2118_v61  ;;  %v2120_v34 = vpop.permute.xlu1 %2119 }
 0xa23   :  { %v2124_v55 = vmul.f32 %v3940_v1, %v2120_v34 }
 0xa24   :  { %2127 = vrot.lane.b32.xlu0 %v2123_v32, %s4138_s16 }
 0xa25   :  { %2129 = vrot.lane.b32.xlu1 %v2124_v55, %s4138_s16  ;;  %v2108_v5 = vpop.permute.xlu0 %2107 }
 0xa26   :  { %v2110_v3 = vpop.permute.xlu1 %2109  ;;  %v2113_v4 = vmul.f32 %v3938_v29, %v2108_v5  ;;  %v2177_v5 = vmul.f32 %v2105_v51, %v4728_v13 }
 0xa27   :  { %v2114_v6 = vmul.f32 %v3940_v1, %v2110_v3  ;;  %v2178_v3 = vmul.f32 %v2106_v60, %v4722_v50 }
 0xa96   :  { %v2128_v7 = vpop.permute.xlu0 %2127 }
 0xa97   :  { %v2133_v9 = vadd.f32 %v2128_v7, %v2113_v4  ;;  %v2130_v52 = vpop.permute.xlu1 %2129 }
 0xa98   :  { %v2134_v53 = vadd.f32 %v2130_v52, %v2114_v6 }
 0xa99   :  { %3941 = vtanh.f32 %v2133_v9 }
 0xa9a   :  { %3943 = vtanh.f32 %v2134_v53 }
 0xaa3   :  { %v3942_v58 = vpop.eup %3941 }
 0xaa4   :  { %v3944_v54 = vpop.eup %3943  ;;  %2139 = vrot.lane.b32.xlu0 %v3942_v58, %s4138_s16 }
 0xaa5   :  { %2141 = vrot.lane.b32.xlu1 %v3944_v54, %s4138_s16 }
 0xb16   :  { %v2140_v57 = vpop.permute.xlu0 %2139 }
 0xb17   :  { %v2145_v16 = vmul.f32 %v3938_v29, %v2140_v57  ;;  %v2142_v10 = vpop.permute.xlu1 %2141 }
 0xb18   :  { %v2146_v25 = vmul.f32 %v3940_v1, %v2142_v10 }
 0xb19   :  { %2149 = vrot.lane.b32.xlu0 %v2145_v16, %s4139_s4 }
 0xb1a   :  { %2151 = vrot.lane.b32.xlu1 %v2146_v25, %s4139_s4 }
 0xb1d   :  { %2167 = vrot.lane.b32.xlu0 %v2133_v9, %s4140_s2 }
 0xb1e   :  { %2169 = vrot.lane.b32.xlu1 %v2134_v53, %s4140_s2 }
 0xb8b   :  { %v2150_v0 = vpop.permute.xlu0 %2149 }
 0xb8c   :  { %v2155_v40 = vmul.f32 %v2150_v0, %v4724_v19  ;;  %v2152_v17 = vpop.permute.xlu1 %2151 }
 0xb8d   :  { %v2156_v45 = vmul.f32 %v2152_v17, %v4719_v15 }
 0xb8e   :  { %v4886_v47 = vadd.f32 %v2161_v38, %v2155_v40 }
 0xb8f   :  { %v4888_v8 = vadd.f32 %v2162_v41, %v2156_v45  ;;  %v2168_v1 = vpop.permute.xlu0 %2167 }
 0xb90   :  { %v2183_v18 = vrot.slane %v4886_v47, 3  ;;  %v2170_v32 = vpop.permute.xlu1 %2169  ;;  %v2173_v34 = vmul.f32 %v2168_v1, %v4724_v19 }
 0xb91   :  { %v2184_v11 = vrot.slane %v4888_v8, 2  ;;  %v2174_v55 = vmul.f32 %v2170_v32, %v4719_v15  ;;  %v2334_v1 = vrot.slane %v4888_v8, 7 }
 0xb92   :  { %v4910_v4 = vadd.f32 %v2177_v5, %v2173_v34 }
 0xb93   :  { %v2185_v48 = vsel %vm1291_vm4, %v2184_v11, %v2183_v18  ;;  %v4912_v7 = vadd.f32 %v2178_v3, %v2174_v55  ;;  %v2338_v3 = vmul.f32 %v2334_v1, %v4722_v50 }
 0xb94   :  { %3572 = vmatmul.mubr.msk.f32.vlgmr.msra.gmra.mrb[14].mxu1 %vm129_vm2, %v2185_v48  ;;  %v2281_v52 = vrot.slane %v4910_v4, 7 }
 0xb95   :  { %3757 = vmatpush3.bf16.msra.mxu1 %v4489_v44  ;;  %3582 = vmatprep.mubr.msk.f32.mxu1 %vm4136_vm8, %v4137_v62  ;;  %v2282_v53 = vrot.slane %v4912_v7, 7 }
 0xb96   :  { %3758 = vmatprep.subr.bf16.mxu1 %v4135_v49 }
 0xb99   :  { %3760 = vmatpush3.bf16.msra.mxu1 %v4507_v56 }
 0xb9a   :  { %3761 = vmatprep.subr.bf16.mxu1 %v4135_v49 }
 0xc67   :  { %v2254_v20 = vpop.f32.mrb[14].mxu1 }
 0xc68   :  { %v2259_v23 = vrot.slane %v2254_v20, 4  ;;  %v2260_v35 = vrot.slane %v2254_v20, 5  ;;  %v3573_v63 = vpop.f32.mrb[15].mxu1 }
 0xc6a   :  { %v2263_v29 = vadd.f32 %v2259_v23, %v4589_v33  ;;  %v2264_v61 = vadd.f32 %v2260_v35, %v4584_v30 }
 0xc6c   :  { %3945 = vtanh.f32 %v2263_v29  ;;  %v3222_v42 = vmul.f32 -1.442695, %v2263_v29  ;;  %v3223_v14 = vmul.f32 -1.442695, %v2264_v61 }
 0xc6d   :  { %3947 = vtanh.f32 %v2264_v61  ;;  %v2333_v61 = vrot.slane %v4886_v47, 7 }
 0xc6e   :  { %3949 = vpow2.f32 %v3222_v42 }
 0xc6f   :  { %3951 = vpow2.f32 %v3223_v14  ;;  %v2337_v34 = vmul.f32 %v2333_v61, %v4728_v13 }
 0xc76   :  { %v3946_v6 = vpop.eup %3945 }
 0xc77   :  { %v3948_v9 = vpop.eup %3947  ;;  %2293 = vrot.lane.b32.xlu0 %v3946_v6, %s4138_s16 }
 0xc78   :  { %2295 = vrot.lane.b32.xlu1 %v3948_v9, %s4138_s16  ;;  %v3950_v51 = vpop.eup %3949 }
 0xc79   :  { %v3952_v60 = vpop.eup %3951  ;;  %v2271_v58 = vadd.f32 1.0, %v3950_v51 }
 0xc7a   :  { %v2272_v54 = vadd.f32 1.0, %v3952_v60 }
 0xc7b   :  { %2283 = vrot.lane.b32.xlu0 %v2281_v52, %s4138_s16  ;;  %3953 = vrcp.f32 %v2271_v58 }
 0xc7c   :  { %2285 = vrot.lane.b32.xlu1 %v2282_v53, %s4138_s16  ;;  %3955 = vrcp.f32 %v2272_v54 }
 0xc85   :  { %v3954_v57 = vpop.eup %3953 }
 0xc86   :  { %v3956_v10 = vpop.eup %3955 }
 0xce9   :  { %v2294_v16 = vpop.permute.xlu0 %2293 }
 0xcea   :  { %v2299_v25 = vmul.f32 %v3954_v57, %v2294_v16  ;;  %v2296_v26 = vpop.permute.xlu1 %2295 }
 0xceb   :  { %v2300_v36 = vmul.f32 %v3956_v10, %v2296_v26 }
 0xcec   :  { %2303 = vrot.lane.b32.xlu0 %v2299_v25, %s4138_s16 }
 0xced   :  { %2305 = vrot.lane.b32.xlu1 %v2300_v36, %s4138_s16  ;;  %v2284_v0 = vpop.permute.xlu0 %2283  ;;  %v2354_v36 = vmul.f32 %v2282_v53, %v4722_v50 }
 0xcee   :  { %v2286_v38 = vpop.permute.xlu1 %2285  ;;  %v2289_v40 = vmul.f32 %v3954_v57, %v2284_v0 }
 0xcef   :  { %v2290_v17 = vmul.f32 %v3956_v10, %v2286_v38 }
 0xd5e   :  { %v2304_v41 = vpop.permute.xlu0 %2303 }
 0xd5f   :  { %v2309_v45 = vadd.f32 %v2304_v41, %v2289_v40  ;;  %v2306_v18 = vpop.permute.xlu1 %2305 }
 0xd60   :  { %v2310_v11 = vadd.f32 %v2306_v18, %v2290_v17 }
 0xd61   :  { %3957 = vtanh.f32 %v2309_v45 }
 0xd62   :  { %3959 = vtanh.f32 %v2310_v11 }
 0xd6b   :  { %v3958_v48 = vpop.eup %3957 }
 0xd6c   :  { %v3960_v20 = vpop.eup %3959  ;;  %2315 = vrot.lane.b32.xlu0 %v3958_v48, %s4138_s16 }
 0xd6d   :  { %2317 = vrot.lane.b32.xlu1 %v3960_v20, %s4138_s16 }
 0xdde   :  { %v2316_v23 = vpop.permute.xlu0 %2315 }
 0xddf   :  { %v2321_v35 = vmul.f32 %v3954_v57, %v2316_v23  ;;  %v2318_v63 = vpop.permute.xlu1 %2317 }
 0xde0   :  { %v2322_v29 = vmul.f32 %v3956_v10, %v2318_v63 }
 0xde1   :  { %2325 = vrot.lane.b32.xlu0 %v2321_v35, %s4139_s4 }
 0xde2   :  { %2327 = vrot.lane.b32.xlu1 %v2322_v29, %s4139_s4 }
 0xde5   :  { %2343 = vrot.lane.b32.xlu0 %v2309_v45, %s4140_s2 }
 0xde6   :  { %2345 = vrot.lane.b32.xlu1 %v2310_v11, %s4140_s2 }
 0xe53   :  { %v2326_v32 = vpop.permute.xlu0 %2325 }
 0xe54   :  { %v2331_v55 = vmul.f32 %v2326_v32, %v4724_v19  ;;  %v2328_v5 = vpop.permute.xlu1 %2327 }
 0xe55   :  { %v2332_v6 = vmul.f32 %v2328_v5, %v4719_v15 }
 0xe56   :  { %v4938_v9 = vadd.f32 %v2337_v34, %v2331_v55 }
 0xe57   :  { %v4940_v42 = vadd.f32 %v2338_v3, %v2332_v6 }
 0xe58   :  { %v2359_v14 = vrot.slane %v4938_v9, 4  ;;  %v2346_v10 = vpop.permute.xlu1 %2345 }
 0xe59   :  { %v2360_v47 = vrot.slane %v4940_v42, 3  ;;  %v2350_v26 = vmul.f32 %v2346_v10, %v4719_v15 }
 0xe5b   :  { %v2361_v8 = vsel %vm1291_vm4, %v2360_v47, %v2359_v14  ;;  %v4964_v40 = vadd.f32 %v2354_v36, %v2350_v26 }
 0xe5c   :  { %3583 = vmatmul.mubr.msk.f32.vlgmr.msra.gmra.mrb[16].mxu1 %vm129_vm2, %v2361_v8 }
 0xe5d   :  { %3763 = vmatpush3.bf16.msra.mxu1 %v4489_v44  ;;  %3593 = vmatprep.mubr.msk.f32.mxu1 %vm4136_vm8, %v4137_v62  ;;  %v2344_v44 = vpop.permute.xlu0 %2343  ;;  %v2458_v45 = vrot.slane %v4964_v40, 7 }
 0xe5e   :  { %3764 = vmatprep.subr.bf16.mxu1 %v4135_v49  ;;  %v2349_v25 = vmul.f32 %v2344_v44, %v4724_v19 }
 0xe61   :  { %3766 = vmatpush3.bf16.msra.mxu1 %v4507_v56  ;;  %v2353_v56 = vmul.f32 %v2281_v52, %v4728_v13 }
 0xe62   :  { %3773 = vmatprep.subr.bf16.mxu1 %v4135_v49 }
 0xe63   :  { %v4962_v0 = vadd.f32 %v2353_v56, %v2349_v25 }
 0xe65   :  { %v2457_v41 = vrot.slane %v4962_v0, 7 }
 0xf2f   :  { %v2430_v51 = vpop.f32.mrb[16].mxu1 }
 0xf30   :  { %v2435_v60 = vrot.slane %v2430_v51, 3  ;;  %v2436_v58 = vrot.slane %v2430_v51, 4  ;;  %v3584_v54 = vpop.f32.mrb[17].mxu1 }
 0xf31   :  { %v2509_v54 = vrot.slane %v4938_v9, 7 }
 0xf32   :  { %v2439_v57 = vadd.f32 %v2435_v60, %v4589_v33  ;;  %v2440_v16 = vadd.f32 %v2436_v58, %v4584_v30 }
 0xf33   :  { %v2513_v44 = vmul.f32 %v2509_v54, %v4728_v13 }
 0xf34   :  { %3961 = vtanh.f32 %v2439_v57  ;;  %v3225_v4 = vmul.f32 -1.442695, %v2439_v57  ;;  %v3226_v7 = vmul.f32 -1.442695, %v2440_v16  ;;  %v2510_v57 = vrot.slane %v4940_v42, 7 }
 0xf35   :  { %3963 = vtanh.f32 %v2440_v16 }
 0xf36   :  { %3965 = vpow2.f32 %v3225_v4  ;;  %v2514_v26 = vmul.f32 %v2510_v57, %v4722_v50 }
 0xf37   :  { %3967 = vpow2.f32 %v3226_v7 }
 0xf3e   :  { %v3962_v38 = vpop.eup %3961 }
 0xf3f   :  { %v3964_v17 = vpop.eup %3963  ;;  %2469 = vrot.lane.b32.xlu0 %v3962_v38, %s4138_s16 }
 0xf40   :  { %2471 = vrot.lane.b32.xlu1 %v3964_v17, %s4138_s16  ;;  %v3966_v52 = vpop.eup %3965 }
 0xf41   :  { %v3968_v53 = vpop.eup %3967  ;;  %v2447_v18 = vadd.f32 1.0, %v3966_v52 }
 0xf42   :  { %v2448_v11 = vadd.f32 1.0, %v3968_v53 }
 0xf43   :  { %2459 = vrot.lane.b32.xlu0 %v2457_v41, %s4138_s16  ;;  %3969 = vrcp.f32 %v2447_v18 }
 0xf44   :  { %2461 = vrot.lane.b32.xlu1 %v2458_v45, %s4138_s16  ;;  %3971 = vrcp.f32 %v2448_v11 }
 0xf4d   :  { %v3970_v48 = vpop.eup %3969 }
 0xf4e   :  { %v3972_v23 = vpop.eup %3971 }
 0xfb1   :  { %v2470_v20 = vpop.permute.xlu0 %2469 }
 0xfb2   :  { %v2475_v35 = vmul.f32 %v3970_v48, %v2470_v20  ;;  %v2472_v63 = vpop.permute.xlu1 %2471 }
 0xfb3   :  { %v2476_v29 = vmul.f32 %v3972_v23, %v2472_v63  ;;  %v2529_v63 = vmul.f32 %v2457_v41, %v4728_v13 }
 0xfb4   :  { %2479 = vrot.lane.b32.xlu0 %v2475_v35, %s4138_s16 }
 0xfb5   :  { %2481 = vrot.lane.b32.xlu1 %v2476_v29, %s4138_s16  ;;  %v2460_v61 = vpop.permute.xlu0 %2459  ;;  %v2530_v29 = vmul.f32 %v2458_v45, %v4722_v50 }
 0xfb6   :  { %v2462_v1 = vpop.permute.xlu1 %2461  ;;  %v2465_v32 = vmul.f32 %v3970_v48, %v2460_v61 }
 0xfb7   :  { %v2466_v34 = vmul.f32 %v3972_v23, %v2462_v1 }
0x1026   :  { %v2480_v55 = vpop.permute.xlu0 %2479 }
0x1027   :  { %v2485_v5 = vadd.f32 %v2480_v55, %v2465_v32  ;;  %v2482_v3 = vpop.permute.xlu1 %2481 }
0x1028   :  { %v2486_v6 = vadd.f32 %v2482_v3, %v2466_v34 }
0x1029   :  { %3973 = vtanh.f32 %v2485_v5 }
0x102a   :  { %3975 = vtanh.f32 %v2486_v6 }
0x1033   :  { %v3974_v14 = vpop.eup %3973 }
0x1034   :  { %v3976_v47 = vpop.eup %3975  ;;  %2491 = vrot.lane.b32.xlu0 %v3974_v14, %s4138_s16 }
0x1035   :  { %2493 = vrot.lane.b32.xlu1 %v3976_v47, %s4138_s16 }
0x10a6   :  { %v2492_v8 = vpop.permute.xlu0 %2491 }
0x10a7   :  { %v2497_v51 = vmul.f32 %v3970_v48, %v2492_v8  ;;  %v2494_v60 = vpop.permute.xlu1 %2493 }
0x10a8   :  { %v2498_v58 = vmul.f32 %v3972_v23, %v2494_v60 }
0x10a9   :  { %2501 = vrot.lane.b32.xlu0 %v2497_v51, %s4139_s4 }
0x10aa   :  { %2503 = vrot.lane.b32.xlu1 %v2498_v58, %s4139_s4 }
0x10ad   :  { %2519 = vrot.lane.b32.xlu0 %v2485_v5, %s4140_s2 }
0x10ae   :  { %2521 = vrot.lane.b32.xlu1 %v2486_v6, %s4140_s2 }
0x111b   :  { %v2502_v16 = vpop.permute.xlu0 %2501 }
0x111c   :  { %v2507_v10 = vmul.f32 %v2502_v16, %v4724_v19  ;;  %v2504_v25 = vpop.permute.xlu1 %2503 }
0x111d   :  { %v2508_v56 = vmul.f32 %v2504_v25, %v4719_v15 }
0x111e   :  { %v4990_v36 = vadd.f32 %v2513_v44, %v2507_v10 }
0x111f   :  { %v4992_v38 = vadd.f32 %v2514_v26, %v2508_v56  ;;  %v2520_v48 = vpop.permute.xlu0 %2519 }
0x1120   :  { %v2535_v17 = vrot.slane %v4990_v36, 5  ;;  %v2522_v20 = vpop.permute.xlu1 %2521  ;;  %v2525_v23 = vmul.f32 %v2520_v48, %v4724_v19 }
0x1121   :  { %v2536_v9 = vrot.slane %v4992_v38, 4  ;;  %v2526_v35 = vmul.f32 %v2522_v20, %v4719_v15 }
0x1122   :  { %v5010_v61 = vadd.f32 %v2529_v63, %v2525_v23 }
0x1123   :  { %v2537_v42 = vsel %vm1291_vm4, %v2536_v9, %v2535_v17  ;;  %v5012_v32 = vadd.f32 %v2530_v29, %v2526_v35 }
0x1124   :  { %3594 = vmatmul.mubr.msk.f32.vlgmr.msra.gmra.mrb[18].mxu1 %vm129_vm2, %v2537_v42  ;;  %v2633_v55 = vrot.slane %v5010_v61, 7 }
0x1125   :  { %3615 = vmatprep.mubr.msk.f32.mxu1 %vm4136_vm8, %v4137_v62  ;;  %v2634_v5 = vrot.slane %v5012_v32, 7 }
0x11f7   :  { %v2606_v4 = vpop.f32.mrb[18].mxu1 }
0x11f8   :  { %v2611_v7 = vrot.slane %v2606_v4, 2  ;;  %v2612_v52 = vrot.slane %v2606_v4, 3  ;;  %v3595_v53 = vpop.f32.mrb[19].mxu1 }
0x11f9   :  { %v2685_v53 = vrot.slane %v4990_v36, 7 }
0x11fa   :  { %v2615_v18 = vadd.f32 %v2611_v7, %v4589_v33  ;;  %v2616_v11 = vadd.f32 %v2612_v52, %v4584_v30 }
0x11fb   :  { %v2689_v48 = vmul.f32 %v2685_v53, %v4728_v13 }
0x11fc   :  { %3977 = vtanh.f32 %v2615_v18  ;;  %v3228_v0 = vmul.f32 -1.442695, %v2615_v18  ;;  %v3229_v40 = vmul.f32 -1.442695, %v2616_v11  ;;  %v2686_v18 = vrot.slane %v4992_v38, 7 }
0x11fd   :  { %3979 = vtanh.f32 %v2616_v11 }
0x11fe   :  { %3981 = vpow2.f32 %v3228_v0  ;;  %v2690_v35 = vmul.f32 %v2686_v18, %v4722_v50 }
0x11ff   :  { %3983 = vpow2.f32 %v3229_v40 }
0x1206   :  { %v3978_v1 = vpop.eup %3977 }
0x1207   :  { %v3980_v34 = vpop.eup %3979  ;;  %2645 = vrot.lane.b32.xlu0 %v3978_v1, %s4138_s16 }
0x1208   :  { %2647 = vrot.lane.b32.xlu1 %v3980_v34, %s4138_s16  ;;  %v3982_v41 = vpop.eup %3981 }
0x1209   :  { %v3984_v45 = vpop.eup %3983  ;;  %v2623_v3 = vadd.f32 1.0, %v3982_v41 }
0x120a   :  { %v2624_v6 = vadd.f32 1.0, %v3984_v45 }
0x120b   :  { %2635 = vrot.lane.b32.xlu0 %v2633_v55, %s4138_s16  ;;  %3985 = vrcp.f32 %v2623_v3 }
0x120c   :  { %2637 = vrot.lane.b32.xlu1 %v2634_v5, %s4138_s16  ;;  %3987 = vrcp.f32 %v2624_v6 }
0x1215   :  { %v3986_v14 = vpop.eup %3985 }
0x1216   :  { %v3988_v8 = vpop.eup %3987 }
0x1279   :  { %v2646_v47 = vpop.permute.xlu0 %2645 }
0x127a   :  { %v2651_v51 = vmul.f32 %v3986_v14, %v2646_v47  ;;  %v2648_v60 = vpop.permute.xlu1 %2647 }
0x127b   :  { %v2652_v58 = vmul.f32 %v3988_v8, %v2648_v60  ;;  %v2705_v60 = vmul.f32 %v2633_v55, %v4728_v13 }
0x127c   :  { %2655 = vrot.lane.b32.xlu0 %v2651_v51, %s4138_s16 }
0x127d   :  { %2657 = vrot.lane.b32.xlu1 %v2652_v58, %s4138_s16  ;;  %v2636_v54 = vpop.permute.xlu0 %2635 }
0x127e   :  { %v2638_v57 = vpop.permute.xlu1 %2637  ;;  %v2641_v16 = vmul.f32 %v3986_v14, %v2636_v54 }
0x127f   :  { %v2642_v44 = vmul.f32 %v3988_v8, %v2638_v57 }
0x12ee   :  { %v2656_v10 = vpop.permute.xlu0 %2655 }
0x12ef   :  { %v2661_v25 = vadd.f32 %v2656_v10, %v2641_v16  ;;  %v2658_v26 = vpop.permute.xlu1 %2657 }
0x12f0   :  { %v2662_v56 = vadd.f32 %v2658_v26, %v2642_v44 }
0x12f1   :  { %3989 = vtanh.f32 %v2661_v25 }
0x12f2   :  { %3991 = vtanh.f32 %v2662_v56 }
0x12fb   :  { %v3990_v17 = vpop.eup %3989 }
0x12fc   :  { %v3992_v9 = vpop.eup %3991  ;;  %2667 = vrot.lane.b32.xlu0 %v3990_v17, %s4138_s16 }
0x12fd   :  { %2669 = vrot.lane.b32.xlu1 %v3992_v9, %s4138_s16 }
0x136e   :  { %v2668_v42 = vpop.permute.xlu0 %2667 }
0x136f   :  { %v2673_v4 = vmul.f32 %v3986_v14, %v2668_v42  ;;  %v2670_v7 = vpop.permute.xlu1 %2669  ;;  %v5048_v14 = vld [vmem:[#allocation5] sm:$0xff] }
0x1370   :  { %v2674_v52 = vmul.f32 %v3988_v8, %v2670_v7  ;;  %v5051_v8 = vld [vmem:[#allocation5 + $0x8] sm:$0xff] }
0x1371   :  { %2677 = vrot.lane.b32.xlu0 %v2673_v4, %s4139_s4 }
0x1372   :  { %2679 = vrot.lane.b32.xlu1 %v2674_v52, %s4139_s4 }
0x1375   :  { %2695 = vrot.lane.b32.xlu0 %v2661_v25, %s4140_s2 }
0x1376   :  { %2697 = vrot.lane.b32.xlu1 %v2662_v56, %s4140_s2 }
0x13e3   :  { %v2678_v11 = vpop.permute.xlu0 %2677 }
0x13e4   :  { %v2683_v20 = vmul.f32 %v2678_v11, %v4724_v19  ;;  %v2680_v23 = vpop.permute.xlu1 %2679 }
0x13e5   :  { %v2684_v63 = vmul.f32 %v2680_v23, %v4719_v15 }
0x13e6   :  { %v5038_v29 = vadd.f32 %v2689_v48, %v2683_v20 }
0x13e7   :  { %v5040_v1 = vadd.f32 %v2690_v35, %v2684_v63  ;;  %v2696_v3 = vpop.permute.xlu0 %2695  ;;  %v1374_v63 = vld [vmem:[%s5253_s5] sm:$0xff] }
0x13e8   :  { %v2711_v34 = vrot.slane %v5038_v29, 6  ;;  %v2698_v6 = vpop.permute.xlu1 %2697  ;;  %v2701_v47 = vmul.f32 %v5048_v14, %v2696_v3  ;;  %v1380_v3 = vld [vmem:[%s5253_s5 + $0x30] sm:$0xff] }
0x13e9   :  { %v2712_v36 = vrot.slane %v5040_v1, 5  ;;  %v2702_v51 = vmul.f32 %v5051_v8, %v2698_v6  ;;  %v1381_v6 = vld [vmem:[%s5253_s5 + $0x38] sm:$0xff] }
0x13eb   :  { %v2713_v38 = vsel %vm1291_vm4, %v2712_v36, %v2711_v34  ;;  %v1375_v34 = vld [vmem:[%s5253_s5 + $0x8] sm:$0xff]  ;;  %v1376_v36 = vld [vmem:[%s5253_s5 + $0x10] sm:$0xff] }
0x13ec   :  { %3605 = vmatmul.mubr.msk.f32.vlgmr.msra.gmra.mrb[4].mxu0 %vm129_vm2, %v2713_v38 }
0x14bf   :  { %v2782_v0 = vpop.f32.mrb[4].mxu0 }
0x14c0   :  { %v2787_v40 = vrot.slane %v2782_v0, 1  ;;  %v2788_v19 = vrot.slane %v2782_v0, 2  ;;  %v3606_v41 = vpop.f32.mrb[5].mxu0  ;;  %v3780_v0 = vpack.c.bf16 %v1375_v34, %v1374_v63  ;;  %v2861_v34 = vrot.slane %v5038_v29, 7 }
0x14c1   :  { %v1378_v41 = vld [vmem:[%s5253_s5 + $0x20] sm:$0xff] }
0x14c2   :  { %v2791_v45 = vadd.f32 %v2787_v40, %v4589_v33  ;;  %v2792_v15 = vadd.f32 %v2788_v19, %v4584_v30  ;;  %v2706_v30 = vmul.f32 %v2634_v5, %v4722_v50  ;;  %v2707_v33 = vadd.f32 %v2705_v60, %v2701_v47  ;;  %v1377_v40 = vld [vmem:[%s5253_s5 + $0x18] sm:$0xff]  ;;  %3781 = vmatpush1.bf16.msra.mxu0 %v3780_v0  ;;  %v1383_v47 = vld [vmem:[%s5253_s5 + $0x48] sm:$0xff] }
0x14c3   :  { %v3783_v19 = vpack.c.bf16 %v1377_v40, %v1376_v36  ;;  %3782 = vmatprep.subr.bf16.mxu0 %v4135_v49 }
0x14c4   :  { %3993 = vtanh.f32 %v2791_v45  ;;  %v2708_v54 = vadd.f32 %v2706_v30, %v2702_v51  ;;  %v2809_v16 = vrot.slane %v2707_v33, 7  ;;  %v3231_v61 = vmul.f32 -1.442695, %v2791_v45  ;;  %v1379_v45 = vld [vmem:[%s5253_s5 + $0x28] sm:$0xff]  ;;  %v1388_v30 = vld [vmem:[%s5253_s5 + $0x70] sm:$0xff]  ;;  %v1389_v33 = vld [vmem:[%s5253_s5 + $0x78] sm:$0xff] }
0x14c5   :  { %3995 = vtanh.f32 %v2792_v15  ;;  %v3232_v55 = vmul.f32 -1.442695, %v2792_v15  ;;  %v3786_v15 = vpack.c.bf16 %v1379_v45, %v1378_v41  ;;  %v1387_v51 = vld [vmem:[%s5253_s5 + $0x68] sm:$0xff] }
0x14c6   :  { %v2810_v44 = vrot.slane %v2708_v54, 7  ;;  %3997 = vpow2.f32 %v3231_v61  ;;  %3784 = vmatpush1.bf16.msra.mxu0 %v3783_v19  ;;  %v1390_v54 = vld [vmem:[%s5253_s5 + $0x80] sm:$0xff]  ;;  %v1393_v61 = vld [vmem:[%s5253_s5 + $0x98] sm:$0xff] }
0x14c7   :  { %3999 = vpow2.f32 %v3232_v55  ;;  %3785 = vmatprep.subr.bf16.mxu0 %v4135_v49 }
0x14ca   :  { %3787 = vmatpush1.bf16.msra.mxu0 %v3786_v15 }
0x14cb   :  { %3788 = vmatprep.subr.bf16.mxu0 %v4135_v49 }
0x14ce   :  { %v3994_v58 = vpop.eup %3993 }
0x14cf   :  { %v3996_v57 = vpop.eup %3995  ;;  %2821 = vrot.lane.b32.xlu0 %v3994_v58, %s4138_s16  ;;  %v3801_v58 = vpack.c.bf16 %v1389_v33, %v1388_v30 }
0x14d0   :  { %2823 = vrot.lane.b32.xlu1 %v3996_v57, %s4138_s16  ;;  %v3998_v32 = vpop.eup %3997  ;;  %v1391_v57 = vld [vmem:[%s5253_s5 + $0x88] sm:$0xff] }
0x14d1   :  { %v4000_v5 = vpop.eup %3999  ;;  %v2799_v10 = vadd.f32 1.0, %v3998_v32  ;;  %v2869_v32 = vld [vmem:[#allocation8] sm:$0xff] }
0x14d2   :  { %v2800_v25 = vadd.f32 1.0, %v4000_v5  ;;  %v2870_v5 = vld [vmem:[#allocation8 + $0x8] sm:$0xff] }
0x14d3   :  { %2811 = vrot.lane.b32.xlu0 %v2809_v16, %s4138_s16  ;;  %4001 = vrcp.f32 %v2799_v10  ;;  %v3804_v16 = vpack.c.bf16 %v1391_v57, %v1390_v54  ;;  %v1394_v10 = vld [vmem:[%s5253_s5 + $0xa0] sm:$0xff]  ;;  %v3037_v57 = vld [vmem:[%s5259_s11 + $0x28] sm:$0xff] }
0x14d4   :  { %2813 = vrot.lane.b32.xlu1 %v2810_v44, %s4138_s16  ;;  %4003 = vrcp.f32 %v2800_v25  ;;  %v1392_v44 = vld [vmem:[%s5253_s5 + $0x90] sm:$0xff]  ;;  %v3774_v25 = vpack.c.bf16 %v2870_v5, %v2869_v32 }
0x14d5   :  { %v3807_v55 = vpack.c.bf16 %v1393_v61, %v1392_v44 }
0x14d6   :  { %3775 = vmatpush3.bf16.msra.mxu1 %v3774_v25 }
0x14d7   :  { %3776 = vmatprep.subr.bf16.mxu1 %v4135_v49 }
0x14dd   :  { %v5064_v26 = vpop.eup %4001 }
0x14de   :  { %v5066_v17 = vpop.eup %4003 }
0x1541   :  { %v2822_v56 = vpop.permute.xlu0 %2821 }
0x1542   :  { %v2827_v9 = vmul.f32 %v5064_v26, %v2822_v56  ;;  %v2824_v42 = vpop.permute.xlu1 %2823  ;;  %v1395_v56 = vld [vmem:[%s5253_s5 + $0xa8] sm:$0xff] }
0x1543   :  { %v2828_v4 = vmul.f32 %v5066_v17, %v2824_v42  ;;  %v2872_v42 = vld [vmem:[#allocation8 + $0x18] sm:$0xff] }
0x1544   :  { %2831 = vrot.lane.b32.xlu0 %v2827_v9, %s4138_s16  ;;  %v2871_v9 = vld [vmem:[#allocation8 + $0x10] sm:$0xff] }
0x1545   :  { %2833 = vrot.lane.b32.xlu1 %v2828_v4, %s4138_s16  ;;  %v2812_v7 = vpop.permute.xlu0 %2811  ;;  %v3810_v4 = vpack.c.bf16 %v1395_v56, %v1394_v10  ;;  %v3235_v10 = vld [vmem:[%s5258_s10] ss:$0 sm:$0xff] }
0x1546   :  { %v2814_v52 = vpop.permute.xlu1 %2813  ;;  %v2817_v53 = vmul.f32 %v5064_v26, %v2812_v7  ;;  %v1396_v7 = vld [vmem:[%s5253_s5 + $0xb0] sm:$0xff] }
0x1547   :  { %v2818_v18 = vmul.f32 %v5066_v17, %v2814_v52  ;;  %v1397_v52 = vld [vmem:[%s5253_s5 + $0xb8] sm:$0xff] }
0x15b6   :  { %v2832_v11 = vpop.permute.xlu0 %2831 }
0x15b7   :  { %v2837_v48 = vadd.f32 %v2832_v11, %v2817_v53  ;;  %v2834_v20 = vpop.permute.xlu1 %2833  ;;  %v3777_v53 = vpack.c.bf16 %v2872_v42, %v2871_v9 }
0x15b8   :  { %v2838_v23 = vadd.f32 %v2834_v20, %v2818_v18  ;;  %v3813_v18 = vpack.c.bf16 %v1397_v52, %v1396_v7 }
0x15b9   :  { %4005 = vtanh.f32 %v2837_v48  ;;  %3778 = vmatpush3.bf16.msra.mxu1 %v3777_v53 }
0x15ba   :  { %4007 = vtanh.f32 %v2838_v23  ;;  %3815 = vmatprep.subr.bf16.mxu1 %v4135_v49 }
0x15c3   :  { %v4006_v35 = vpop.eup %4005 }
0x15c4   :  { %v4008_v38 = vpop.eup %4007  ;;  %2843 = vrot.lane.b32.xlu0 %v4006_v35, %s4138_s16 }
0x15c5   :  { %2845 = vrot.lane.b32.xlu1 %v4008_v38, %s4138_s16  ;;  %v2862_v38 = vrot.slane %v5040_v1, 7 }
0x15c7   :  { %v2866_v45 = vmul.f32 %v2862_v38, %v4722_v50 }
0x15c8   :  { %1297 = vrot.lane.b32.xlu0 %v4647_v24, %s4141_s14  ;;  %v3789_v24 = vpack.c.bf16 %v1381_v6, %v1380_v3  ;;  %v3033_v3 = vld [vmem:[%s5259_s11 + $0x8] sm:$0xff] }
0x15c9   :  { %1303 = vrot.lane.b32.xlu1 %v4652_v27, %s4138_s16  ;;  %v1382_v27 = vld [vmem:[%s5253_s5 + $0x40] sm:$0xff] }
0x15ca   :  { %3790 = vmatpush1.bf16.msra.mxu0 %v3789_v24  ;;  %v3792_v22 = vpack.c.bf16 %v1383_v47, %v1382_v27 }
0x15cb   :  { %3791 = vmatprep.subr.bf16.mxu0 %v4135_v49 }
0x15cc   :  { %3877 = vrot.lane.b32.xlu0 %v3876_v21, %s4142_s21 }
0x15cd   :  { %1339 = vrot.lane.b32.xlu1 %v4655_v31, %s4140_s2  ;;  %v1384_v31 = vld [vmem:[%s5253_s5 + $0x50] sm:$0xff] }
0x15ce   :  { %3793 = vmatpush1.bf16.msra.mxu0 %v3792_v22  ;;  %v3795_v21 = vpack.c.bf16 %v1385_v12, %v1384_v31  ;;  %v3034_v31 = vld [vmem:[%s5259_s11 + $0x10] sm:$0xff]  ;;  %v3035_v12 = vld [vmem:[%s5259_s11 + $0x18] sm:$0xff] }
0x15cf   :  { %3794 = vmatprep.subr.bf16.mxu0 %v4135_v49  ;;  %v3819_v54 = vpack.c.bf16 %v3035_v12, %v3034_v31 }
0x15d0   :  { %1345 = vrot.lane.b32.xlu0 %v4674_v28, %s4143_s15  ;;  %v1386_v28 = vld [vmem:[%s5253_s5 + $0x60] sm:$0xff]  ;;  %s4144_s5 = smov 80   ;;  %s3127_s15 = sshll.u32 %s4145_s8, 4  ;;  %s3128_s15 = int_to_ptr.vmem [resolvable:$true] %s3127_s15 }
0x15d1   :  { %v3798_v60 = vpack.c.bf16 %v1387_v51, %v1386_v28  ;;  %s4099_s16 = scalar_lea.vmem %s3128_s15, 32  ;;  %p4104_p5 = scmp.lt.s32.totalorder %s3128_s15, %s3128_s15 }
0x15d2   :  { %3796 = vmatpush1.bf16.msra.mxu0 %v3795_v21  ;;  %p4100_p4 = scmp.ne.s32.totalorder %s3128_s15, %s4099_s16  ;;  %p4105_p6 = scmp.lt.s32.totalorder %s4099_s16, %s4099_s16 }
0x15d3   :  { %3797 = vmatprep.subr.bf16.mxu0 %v4135_v49 }
0x15d4   :  { %p4106_p7 = por %p4105_p6, %p4104_p5 }
0x15d6   :  { %3799 = vmatpush1.bf16.msra.mxu0 %v3798_v60  ;;  %p4107_p8 = pnand %p4106_p7, %p4100_p4 }
0x15d7   :  { %3800 = vmatprep.subr.bf16.mxu0 %v4135_v49 }
0x15da   :  { %3802 = vmatpush1.bf16.msra.mxu0 %v3801_v58 }
0x15db   :  { %3803 = vmatprep.subr.bf16.mxu0 %v4135_v49 }
0x15de   :  { %3805 = vmatpush1.bf16.msra.mxu0 %v3804_v16  ;;  %v3038_v16 = vld [vmem:[%s5259_s11 + $0x30] sm:$0xff] }
0x15df   :  { %3806 = vmatprep.subr.bf16.mxu0 %v4135_v49 }
0x15e2   :  { %3808 = vmatpush1.bf16.msra.mxu0 %v3807_v55 }
0x15e3   :  { %3809 = vmatprep.subr.bf16.mxu0 %v4135_v49 }
0x15e6   :  { %3811 = vmatpush1.bf16.msra.mxu0 %v3810_v4  ;;  %v3236_v4 = vld [vmem:[%s5260_s12] ss:$0 sm:$0xff] }
0x15e7   :  { %3812 = vmatprep.subr.bf16.mxu0 %v4135_v49 }
0x15ea   :  { %3814 = vmatpush1.bf16.msra.mxu0 %v3813_v18 }
0x1636   :  { %v2844_v11 = vpop.permute.xlu0 %2843 }
0x1637   :  { %v2849_v48 = vmul.f32 %v5064_v26, %v2844_v11  ;;  %v2846_v20 = vpop.permute.xlu1 %2845 }
0x1638   :  { %v2850_v23 = vmul.f32 %v5066_v17, %v2846_v20 }
0x1639   :  { %2853 = vrot.lane.b32.xlu1 %v2849_v48, %s4139_s4 }
0x163a   :  { %2855 = vrot.lane.b32.xlu0 %v2850_v23, %s4139_s4  ;;  %v1298_v26 = vpop.permute.xlu0 %1297 }
0x163b   :  { %v1304_v17 = vpop.permute.xlu1 %1303 }
0x163d   :  { %1321 = vrot.lane.b32.xlu1 %v4693_v59, %s4139_s4  ;;  %v1359_v59 = vsel %vm1358_vm12, %v4682_v43, %v1298_v26  ;;  %v3032_v43 = vld [vmem:[%s5259_s11] sm:$0xff] }
0x163e   :  { %1327 = vrot.lane.b32.xlu0 %v4698_v37, %s4144_s5  ;;  %v3878_v35 = vpop.permute.xlu0 %3877  ;;  %v3816_v22 = vpack.c.bf16 %v3033_v3, %v3032_v43 }
0x163f   :  { %v1340_v63 = vpop.permute.xlu1 %1339  ;;  %v3879_v37 = vunpack.i.l.bf16 %v3878_v35  ;;  %v3880_v40 = vunpack.i.h.bf16 %v3878_v35 }
0x1641   :  { %1355 = vrot.lane.b32.xlu1 %v4704_v39, %s4141_s14  ;;  %v1360_v39 = vsel %vm129_vm2, %v1359_v59, %v1304_v17 }
0x1642   :  { %1333 = vrot.lane.b32.xlu0 %v4701_v2, %s4140_s2  ;;  %v1346_v36 = vpop.permute.xlu0 %1345  ;;  %v2865_v2 = vmul.f32 %v2861_v34, %v4728_v13  ;;  %v1362_v1 = vsel %vm1361_vm13, %v1360_v39, %v3879_v37 }
0x1643   :  { %v1364_v50 = vsel %vm1363_vm5, %v1362_v1, %v3880_v40 }
0x16ab   :  { %v2854_v0 = vpop.permute.xlu1 %2853 }
0x16ac   :  { %v2859_v19 = vmul.f32 %v5048_v14, %v2854_v0  ;;  %v2856_v41 = vpop.permute.xlu0 %2855  ;;  %v1371_v14 = vsel %vm1358_vm12, %v1340_v63, %v1346_v36 }
0x16ad   :  { %v2860_v29 = vmul.f32 %v5051_v8, %v2856_v41  ;;  %v1372_v28 = vsel %vm129_vm2, %v1371_v14, %v4707_v46  ;;  %v3036_v46 = vld [vmem:[%s5259_s11 + $0x20] sm:$0xff] }
0x16ae   :  { %v2867_v15 = vadd.f32 %v2865_v2, %v2859_v19  ;;  %v3822_v44 = vpack.c.bf16 %v3037_v57, %v3036_v46 }
0x16af   :  { %v2868_v13 = vadd.f32 %v2866_v45, %v2860_v29  ;;  %v1322_v6 = vpop.permute.xlu1 %1321 }
0x16b0   :  { %v2875_v24 = vrot.slane %v2867_v15, 7  ;;  %v1328_v8 = vpop.permute.xlu0 %1327  ;;  %v1366_v47 = vsel %vm1365_vm14, %v1364_v50, %v1322_v6 }
0x16b1   :  { %v2876_v27 = vrot.slane %v2868_v13, 6  ;;  %v1368_v60 = vsel %vm1367_vm15, %v1366_v47, %v1328_v8 }
0x16b3   :  { %v1356_v21 = vpop.permute.xlu1 %1355  ;;  %v2877_v51 = vsel %vm1291_vm4, %v2876_v27, %v2875_v24 }
0x16b4   :  { %v1373_v30 = vsel %vm1361_vm13, %v1372_v28, %v1356_v21  ;;  %3616 = vmatmul.mubr.msk.f32.vlgmr.msra.gmra.mrb[20].mxu1 %vm129_vm2, %v2877_v51  ;;  %v1334_v33 = vpop.permute.xlu0 %1333 }
0x16b5   :  { %v1370_v58 = vsel %vm1369_vm0, %v1368_v60, %v1334_v33  ;;  %3234 = vmatprep.mubr.msk.f32.mxu0 %vm1363_vm5, %v1373_v30  ;;  %3817 = vmatpush3.bf16.msra.mxu1 %v3816_v22 }
0x16b6   :  { %3018 = vmatmul.mubr.f32.vlgmr.msra.gmra.mrb[6].mxu0 %v1370_v58  ;;  %3818 = vmatprep.subr.bf16.mxu1 %v4135_v49 }
0x16b7   :  { %3634 = vmatprep.mubr.msk.f32.mxu1 %vm4136_vm8, %v4137_v62  ;;  %v3039_v62 = vld [vmem:[%s5259_s11 + $0x38] sm:$0xff] }
0x16b8   :  { %v3825_v61 = vpack.c.bf16 %v3039_v62, %v3038_v16 }
0x16b9   :  { %3820 = vmatpush3.bf16.msra.mxu1 %v3819_v54 }
0x16ba   :  { %3821 = vmatprep.subr.bf16.mxu1 %v4135_v49 }
0x16bd   :  { %3823 = vmatpush3.bf16.msra.mxu1 %v3822_v44 }
0x16be   :  { %3824 = vmatprep.subr.bf16.mxu1 %v4135_v49 }
0x16c1   :  { %3826 = vmatpush3.bf16.msra.mxu1 %v3825_v61 }
0x1787   :  { %v2946_v55 = vpop.f32.mrb[20].mxu1 }
0x1788   :  { %v3617_v32 = vpop.f32.mrb[21].mxu1 }
0x1789   :  { %v3019_v5 = vpop.f32.mrb[6].mxu0 }
0x178a   :  { %v3020_v25 = vadd.f32 %v3019_v5, %v2946_v55  ;;  %v3021_v56 = vpop.f32.mrb[7].mxu0 }
0x178c   :  { %v3030_v9 = vadd.f32 %v3235_v10, %v3020_v25 }
0x178e   :  { %v3031_v42 = vmax.f32 %v3030_v9, 0.0 }
0x1790   :  { %3635 = vmatmul.mubr.msk.f32.vlgmr.msra.gmra.mrb[22].mxu1 %vm1363_vm5, %v3031_v42 }
0x1863   :  { %v3116_v49 = vpop.f32.mrb[22].mxu1 }
0x1864   :  { %v3117_v7 = vadd.f32 %v3236_v4, %v3116_v49  ;;  %v3636_v52 = vpop.f32.mrb[23].mxu1 }
0x1866   :  { %3120 = vst [vmem:[#allocation10] sm:$0x3] %v3117_v7 }
0x1867   :  { %4110 = shalt.err (!%p4107_p8)
}
0x1868   :  { %s4111_s17 = scalar_lea.hbm %s5261_s13, 32 }
0x1869   :  { %p4112_p9 = scmp.ne.s32.totalorder %s5261_s13, %s4111_s17  ;;  %p4115_p10 = scmp.lt.u32.totalorder %s4111_s17, %s5261_s13 }
0x186b   :  { %p4117_p11 = pnand %p4115_p10, %p4112_p9 }
0x186d   :  { %4120 = shalt.err (!%p4117_p11)
}
0x186e   :  { %3130 = dma.vmem_to_hbm [thread:$0]  %s3128_s15, 32, %s5261_s13, [#allocation4]  }
0x186f   :  { %4127 = dma.done.wait [#allocation4], 32  }
0x1870   :  { %4128 = vsyncadd [#allocation4], 4294967264 }
0x1871   :  { %3134 = vsyncpa [#allocation3], 1 }
0x1872   :  { %3135 = vsyncpa [#allocation6], 1 }
0x1873   :  { %3136 = vsyncpa [#allocation9], 1 }
0x1874   :  { %3137 = vsyncpa [#allocation4], 1 }

</bundles_post_ra>
